<compile_context>
chip_gen: v5e
topology: v5e:2x2
jax: 0.10.0
libtpu: 0.0.40
codegen_flags: <defaults>
</compile_context>

<pallas_src>
import functools

import numpy as np
import jax
import jax.numpy as jnp
from jax import lax
from jax.experimental import pallas as pl
from jax.experimental.pallas import tpu as pltpu

EPS = 1e-5
LANE = 128
SUBLANE = 8


def _round_up(x, m):
    return (x + m - 1) // m * m


def _largest_divisor_leq(n, cap):
    cap = max(1, min(int(cap), n))
    for d in range(cap, 0, -1):
        if n % d == 0:
            return d
    return 1


def _vmem_budget():
    """Chip-aware (tiling budget, vmem_limit_bytes)."""
    try:
        cap = int(pltpu.get_tpu_info().vmem_capacity_bytes)
    except Exception:
        cap = None
    if cap is None:
        return 12 << 20, 32 << 20            # unknown chip: stay conservative
    if cap <= (64 << 20):                    # v7x: 64 MiB per TensorCore
        return 14 << 20, 44 << 20
    return 26 << 20, 64 << 20                # v5e / v6e: 128 MiB


def _vmem_bytes_per_step(s, tr, wo, qcp, cin_pad, f_pad, cout_pad, cout):
    """Per-grid-step VMEM estimate: double-buffered in/out blocks, constant
    weight blocks, both scratches and the large f32 live values (lane/sublane
    padding included)."""
    nph = s * s
    qr = tr + 2 + 2 // s
    ny = tr + 2
    lane = lambda n: _round_up(n, LANE)
    sub = lambda n: _round_up(n, SUBLANE)
    b = 0
    b += 2 * nph * qr * sub(qcp) * lane(cin_pad) * 2                    # input block (bf16)
    b += 2 * sub(tr * wo) * lane(cout) * 4                              # output block (f32)
    b += 2 * (sub(9 * cin_pad) * lane(f_pad) * 2 + sub(9) * lane(f_pad) * 4
              + 3 * lane(f_pad) * 4 + sub(f_pad) * lane(cout_pad) * 2
              + sub(cin_pad) * lane(cout_pad) * 2 + 2 * lane(cout_pad) * 4)
    b += ny * sub(wo + 2) * lane(f_pad) * 4                             # ypad scratch
    b += ny * sub(wo) * lane(9 * cin_pad) * 4                           # conv1 K-staging scratch
    b += nph * qr * sub(qcp) * lane(cin_pad) * 4                        # f32 tile copy
    b += sub(ny * wo) * (lane(9 * cin_pad) + lane(f_pad)) * 4           # staged operand + y
    b += sub(tr * wo) * (lane(f_pad) + 3 * lane(cout_pad)) * 4          # dw, z, sk, out
    b += 2 * sub(nph * qr * qcp) * lane(cout_pad) * 4                   # skip pre-pool map
    return b


def _pick_tile_rows(ho, wo, fits):
    divisors = [d for d in range(1, ho + 1) if ho % d == 0]
    ok = [d for d in divisors if fits(d)] or [1]
    # prefer an MXU-friendly matmul M (= TR*Wo multiple of 8), then the biggest
    # tile that fits the budget (tile size is the dominant mem-bound lever).
    pref = [d for d in ok if (d * wo) % SUBLANE == 0] or ok
    return max(pref)


# ----------------------------- fused Pallas kernel -----------------------------

def _encoder_kernel(xph_ref, w1_ref, b1_ref, wdw_ref, bdw_ref, wpc_ref, bpc_ref,
                    ws_ref, bs_ref, alphas_ref,
                    out_ref, ypad_ref, x9_ref, *,
                    s, tr, wo, cin, cout, f_pad, cout_pad):
    """One grid step = `tr` output rows (full width) of one batch image."""
    t = pl.program_id(1)
    nph = s * s
    ny = tr + 2                      # conv1 rows incl. depthwise halo
    qr = tr + 2 + 2 // s             # phase-split rows in this tile
    qcp = xph_ref.shape[2]           # (8-aligned) phase-split cols

    a1 = alphas_ref[0]               # PReLU alphas from SMEM (scalar slot)
    a_skip = alphas_ref[1]
    a2 = alphas_ref[2]
    a_out = alphas_ref[3]

    # Input tile: bf16 in HBM, ONE cast to a f32 working copy (keeps the many
    # shifted sub-slices / reshapes on the well-supported unpacked path).
    xf = xph_ref[...].astype(jnp.float32)

    # ---- conv1 (3x3 / stride s) + folded BN + PReLU: stage all 9 taps side by
    #      side along K in VMEM scratch, then ONE MXU call with K = 9*cin ----
    for i in range(3):
        for j in range(3):
            k = i * 3 + j
            ph = (i % s) * s + (j % s)
            x9_ref[:, :, k * cin:(k + 1) * cin] = xf[ph, i // s:i // s + ny,
                                                     j // s:j // s + wo, :]
    xk = x9_ref[...].reshape(ny * wo, 9 * cin).astype(jnp.bfloat16)
    y = jnp.dot(xk, w1_ref[...], preferred_element_type=jnp.float32) + b1_ref[...]
    y = jnp.where(y >= 0.0, y, a1 * y)

    # Halo rows outside [0, Ho) are the depthwise conv's zero padding -> zero them.
    fi = lax.broadcasted_iota(jnp.int32, (ny * wo, 1), 0)
    top_ok = jnp.logical_or(t > 0, fi >= wo)
    bot_ok = jnp.logical_or(t < pl.num_programs(1) - 1, fi < (ny - 1) * wo)
    y = jnp.where(jnp.logical_and(top_ok, bot_ok), y, 0.0)

    # ---- depthwise 3x3 (pad 1, stride 1): only the 2 zero border columns are
    #      written, interior is fully overwritten; 9 unrolled VPU FMAs ----
    ypad_ref[:, 0:1, :] = jnp.zeros((ny, 1, f_pad), jnp.float32)
    ypad_ref[:, wo + 1:wo + 2, :] = jnp.zeros((ny, 1, f_pad), jnp.float32)
    ypad_ref[:, 1:wo + 1, :] = y.reshape(ny, wo, f_pad)
    ypad = ypad_ref[...]
    dw = jnp.zeros((tr, wo, f_pad), jnp.float32)
    for i in range(3):
        for j in range(3):
            k = i * 3 + j
            dw = dw + ypad[i:i + tr, j:j + wo, :] * wdw_ref[k:k + 1, :]
    dw = dw.reshape(tr * wo, f_pad) + bdw_ref[...]

    # ---- pointwise 1x1 and conv2 1x1 (+folded BN) fused into ONE matmul ----
    z = jnp.dot(dw.astype(jnp.bfloat16), wpc_ref[...],
                preferred_element_type=jnp.float32) + bpc_ref[...]
    z = jnp.where(z >= 0.0, z, a2 * z)

    # ---- skip: 1x1 conv (+folded BN) + PReLU ONCE on the pre-pool grid
    #      (single matmul), then the 3x3/stride maxpool as 9 shifted maxes ----
    xs = xf.reshape(nph * qr * qcp, cin).astype(jnp.bfloat16)
    v = jnp.dot(xs, ws_ref[...], preferred_element_type=jnp.float32) + bs_ref[...]
    v = jnp.where(v >= 0.0, v, a_skip * v)
    pp = v.reshape(nph, qr, qcp, cout_pad)
    sk = None
    for i in range(3):
        for j in range(3):
            ph = (i % s) * s + (j % s)
            cand = pp[ph, 1 + i // s:1 + i // s + tr, j // s:j // s + wo, :]
            sk = cand if sk is None else jnp.maximum(sk, cand)
    sk = sk.reshape(tr * wo, cout_pad)

    # ---- residual add + final PReLU; store only the real Cout channels ----
    out = z + sk
    out = jnp.where(out >= 0.0, out, a_out * out)
    out_ref[...] = out[:, :cout]


# ----------------------------- wrapper glue -----------------------------

def _fold_bn(bn):
    gamma, beta, mean, var = bn
    scale = gamma / jnp.sqrt(var + EPS)
    shift = beta - mean * scale
    return scale, shift


def _pad2(m, rows, cols, dtype):
    out = jnp.zeros((rows, cols), jnp.float32)
    return out.at[:m.shape[0], :m.shape[1]].set(m).astype(dtype)


def _pad_row(v, cols):
    out = jnp.zeros((1, cols), jnp.float32)
    return out.at[0, :v.shape[0]].set(v)


def _phase_split_tiles(x, s, pad, TR, T, QR, QCP, cin_pad):
    """[N,H,W,Cin] -> [N, T, s*s, QR, QCP, cin_pad].

    Per-row-tile (halo-overlapping) windows of the zero-padded input, split
    into the s*s stride phases so every 3x3 tap in the kernel is a unit-stride
    slice.  Only the small row-halo is duplicated in HBM (no 9x im2col)."""
    N, H, W, Cin = x.shape
    rows_ext = ((T - 1) * TR + QR) * s
    cols_ext = QCP * s
    top = pad + s                 # extra s rows: halo row above output-row 0
    bottom = max(0, rows_ext - H - top)
    left = pad
    right = max(0, cols_ext - W - left)
    xe = jnp.pad(x, ((0, 0), (top, bottom), (left, right), (0, cin_pad - Cin)))
    xe = xe[:, :rows_ext, :cols_ext, :]
    phases = []
    for pr in range(s):
        for pc in range(s):
            ph = xe[:, pr::s, pc::s, :]                            # [N, *, QCP, cin_pad]
            phases.append(jnp.stack([ph[:, t * TR:t * TR + QR]
                                     for t in range(T)], axis=1))  # [N, T, QR, QCP, cin_pad]
    return jnp.stack(phases, axis=2)


def encoder_forward(x_nhwc, P, stride, pad_basic, tile_rows=None):
    N, H, W, Cin = x_nhwc.shape
    F = P["w1"].shape[-1]
    Cout = P["w2"].shape[-1]
    s = int(stride)
    Ho = (H + 2 * pad_basic - 3) // s + 1
    Wo = (W + 2 * pad_basic - 3) // s + 1

    F_PAD = _round_up(F, LANE)                  # lane-dense intermediate channels
    COUT_PAD = _round_up(Cout, LANE)            # lane-dense channels inside the kernel
    CIN_PAD = _round_up(Cin, SUBLANE)
    QCP = _round_up(Wo + 2 // s, SUBLANE)       # 8-aligned phase-split cols
    NPH = s * s

    budget, vmem_limit = _vmem_budget()
    if tile_rows is None:
        fits = lambda tr_: _vmem_bytes_per_step(
            s, tr_, Wo, QCP, CIN_PAD, F_PAD, COUT_PAD, Cout) <= budget
        TR = _pick_tile_rows(Ho, Wo, fits)
    else:
        TR = _largest_divisor_leq(Ho, tile_rows)
    T = Ho // TR
    NY = TR + 2                                 # conv1 rows incl. depthwise halo
    QR = TR + 2 + 2 // s                        # phase-split rows per tile

    xph = _phase_split_tiles(x_nhwc.astype(jnp.bfloat16), s, pad_basic,
                             TR, T, QR, QCP, CIN_PAD)

    # Fold BN into conv weights / biases; compose in f32; single bf16 cast.
    sc1, sh1 = _fold_bn(P["bn1"])
    w1k = jnp.zeros((9, CIN_PAD, F_PAD), jnp.float32)
    w1k = w1k.at[:, :Cin, :F].set((P["w1"] * sc1).reshape(9, Cin, F))
    w1k = w1k.reshape(9 * CIN_PAD, F_PAD).astype(jnp.bfloat16)   # merged-tap conv1 weight
    b1p = _pad_row(P["b1"] * sc1 + sh1, F_PAD)

    wdwp = jnp.zeros((9, F_PAD), jnp.float32).at[:, :F].set(P["wdw"])   # VPU path: f32
    bdwp = _pad_row(P["bdw"], F_PAD)

    sc2, sh2 = _fold_bn(P["bn2"])
    w2f = P["w2"] * sc2                                   # conv2 with BN folded, f32
    wpc = P["wpw"] @ w2f                                  # pointwise o conv2, composed in f32
    bpc = P["bpw"] @ w2f + (P["b2"] * sc2 + sh2)
    wpcp = _pad2(wpc, F_PAD, COUT_PAD, jnp.bfloat16)
    bpcp = _pad_row(bpc, COUT_PAD)

    scs, shs = _fold_bn(P["bns"])
    wsp = _pad2(P["ws"] * scs, CIN_PAD, COUT_PAD, jnp.bfloat16)
    bsp = _pad_row(P["bs"] * scs + shs, COUT_PAD)

    alphas = jnp.stack([P["a1"], P["a_s"], P["a2"], P["aout"]]).astype(jnp.float32)

    kernel = functools.partial(_encoder_kernel, s=s, tr=TR, wo=Wo, cin=CIN_PAD,
                               cout=Cout, f_pad=F_PAD, cout_pad=COUT_PAD)

    def _const(shape):
        nd = len(shape)
        return pl.BlockSpec(shape, lambda n, t, _nd=nd: (0,) * _nd)

    # Advisory cost estimate so XLA can schedule the phase-split pre-pass around
    # the custom call.
    flops = int(2 * N * Ho * Wo * (9 * Cin * F + 9 * F + F * Cout)
                + 2 * N * NPH * T * QR * QCP * Cin * Cout)
    bytes_accessed = int(xph.size * xph.dtype.itemsize
                         + N * Ho * Wo * Cout * 4
                         + sum(int(a.size) * a.dtype.itemsize
                               for a in (w1k, wpcp, wsp, wdwp)))
    ce = pl.CostEstimate(flops=flops, transcendentals=0,
                         bytes_accessed=bytes_accessed)

    out4 = pl.pallas_call(
        kernel,
        out_shape=jax.ShapeDtypeStruct((N, T, TR * Wo, Cout), jnp.float32),
        grid=(N, T),
        in_specs=[
            pl.BlockSpec((None, None, NPH, QR, QCP, CIN_PAD),
                         lambda n, t: (n, t, 0, 0, 0, 0)),
            _const(w1k.shape), _const(b1p.shape),
            _const(wdwp.shape), _const(bdwp.shape),
            _const(wpcp.shape), _const(bpcp.shape),
            _const(wsp.shape), _const(bsp.shape),
            pl.BlockSpec(memory_space=pltpu.MemorySpace.SMEM),    # PReLU alphas
        ],
        out_specs=pl.BlockSpec((None, None, TR * Wo, Cout),
                               lambda n, t: (n, t, 0, 0)),
        scratch_shapes=[pltpu.VMEM((NY, Wo + 2, F_PAD), jnp.float32),      # ypad
                        pltpu.VMEM((NY, Wo, 9 * CIN_PAD), jnp.float32)],   # conv1 K-staging
        compiler_params=pltpu.CompilerParams(
            # both axes parallel: megacore (v7x) can shard the (N, T) space
            dimension_semantics=("parallel", "parallel"),
            vmem_limit_bytes=int(vmem_limit)),
        cost_estimate=ce,
    )(xph, w1k, b1p, wdwp, bdwp, wpcp, bpcp, wsp, bsp, alphas)

    # Pure metadata reshape -- no channel-slice pass over HBM anymore.
    return out4.reshape(N, Ho, Wo, Cout)


# ----------------------------- pure-JAX reference -----------------------------

def ref_encoder(x, P, stride, pad):
    HI = lax.Precision.HIGHEST

    def conv(x, w, b, s, p, groups=1):
        y = lax.conv_general_dilated(
            x, w, (s, s), [(p, p), (p, p)],
            dimension_numbers=("NHWC", "HWIO", "NHWC"),
            feature_group_count=groups, precision=HI)
        return y + b

    def bn(y, prm):
        g, bta, m, v = prm
        return (y - m) / jnp.sqrt(v + EPS) * g + bta

    def prelu(y, a):
        return jnp.where(y >= 0.0, y, a * y)

    Cin = x.shape[-1]
    F = P["w1"].shape[-1]
    Cout = P["w2"].shape[-1]

    y = prelu(bn(conv(x, P["w1"], P["b1"], stride, pad), P["bn1"]), P["a1"])
    y = conv(y, P["wdw"].reshape(3, 3, 1, F), P["bdw"], 1, 1, groups=F)
    y = conv(y, P["wpw"].reshape(1, 1, F, F), P["bpw"], 1, 0)
    y = prelu(bn(conv(y, P["w2"].reshape(1, 1, F, Cout), P["b2"], 1, 0),
                 P["bn2"]), P["a2"])
    sk = prelu(bn(conv(x, P["ws"].reshape(1, 1, Cin, Cout), P["bs"], 1, pad),
                  P["bns"]), P["a_s"])
    sk = lax.reduce_window(sk, -jnp.inf, lax.max, (1, 3, 3, 1),
                           (1, stride, stride, 1), "VALID")
    return prelu(y + sk, P["aout"])


# ----------------------------- parameters -----------------------------

def init_params(key, cin, infilter, outfilter, reluw):
    ks = jax.random.split(key, 13)

    def w(k, shape, scale=0.1):
        return scale * jax.random.normal(k, shape, jnp.float32)

    def bn(k, c):
        k1, k2, k3, k4 = jax.random.split(k, 4)
        gamma = 1.0 + 0.1 * jax.random.normal(k1, (c,), jnp.float32)
        beta = 0.1 * jax.random.normal(k2, (c,), jnp.float32)
        mean = 0.1 * jax.random.normal(k3, (c,), jnp.float32)
        var = 0.5 + jax.random.uniform(k4, (c,), jnp.float32)
        return (gamma, beta, mean, var)

    a = jnp.float32(reluw)
    return {
        "w1": w(ks[0], (3, 3, cin, infilter)),   "b1": w(ks[1], (infilter,)),
        "bn1": bn(ks[2], infilter),              "a1": a,
        "wdw": w(ks[3], (9, infilter)),          "bdw": w(ks[4], (infilter,)),
        "wpw": w(ks[5], (infilter, infilter)),   "bpw": w(ks[6], (infilter,)),
        "w2": w(ks[7], (infilter, outfilter)),   "b2": w(ks[8], (outfilter,)),
        "bn2": bn(ks[9], outfilter),             "a2": a,
        "ws": w(ks[10], (cin, outfilter)),       "bs": w(ks[11], (outfilter,)),
        "bns": bn(ks[12], outfilter),            "a_s": a,
        "aout": a,
    }


# ----------------------------- main -----------------------------

if __name__ == "__main__":
    N, Cin, H, W = 2, 4, 16, 16
    infilter, outfilter = 8, 8
    stride, pad_basic, reluw = 2, 1, 0.05

    key = jax.random.PRNGKey(0)
    kx, kp = jax.random.split(key)
    P = init_params(kp, Cin, infilter, outfilter, reluw)

    x_nchw = jax.random.normal(kx, (N, Cin, H, W), jnp.float32)   # PyTorch layout
    x_nhwc = jnp.transpose(x_nchw, (0, 2, 3, 1))                  # kernel layout

    # tile_rows=4 -> 2 row-tiles per image: exercises the pipelined grid + halo path.
    out_nhwc = encoder_forward(x_nhwc, P, stride, pad_basic, tile_rows=4)
    out_nhwc = jax.block_until_ready(out_nhwc)

    ref_nhwc = ref_encoder(x_nhwc, P, stride, pad_basic)
    # bf16 MXU operands (f32 accumulation) -> tolerance validated vs f32 reference.
    np.testing.assert_allclose(np.asarray(out_nhwc), np.asarray(ref_nhwc),
                               rtol=3e-2, atol=3e-2)

    out_nchw = jnp.transpose(out_nhwc, (0, 3, 1, 2))  # back to PyTorch NCHW
    assert out_nchw.shape == (N, outfilter, H // stride, W // stride)
    print("KERNEL_OK")
</pallas_src>

<mosaic_0001>
module attributes {stable_mosaic.version = 11 : i64} {
  func.func @_encoder_kernel(%arg0: i32, %arg1: i32, %arg2: memref<1x1x4x7x16x8xbf16, #tpu.memory_space<vmem>>, %arg3: memref<72x128xbf16, #tpu.memory_space<vmem>>, %arg4: memref<1x128xf32, #tpu.memory_space<vmem>>, %arg5: memref<9x128xf32, #tpu.memory_space<vmem>>, %arg6: memref<1x128xf32, #tpu.memory_space<vmem>>, %arg7: memref<128x128xbf16, #tpu.memory_space<vmem>>, %arg8: memref<1x128xf32, #tpu.memory_space<vmem>>, %arg9: memref<8x128xbf16, #tpu.memory_space<vmem>>, %arg10: memref<1x128xf32, #tpu.memory_space<vmem>>, %arg11: memref<4xf32, #tpu.memory_space<smem>>, %arg12: memref<1x1x32x8xf32, #tpu.memory_space<vmem>>, %arg13: memref<6x10x128xf32, #tpu.memory_space<vmem>>, %arg14: memref<6x8x72xf32, #tpu.memory_space<vmem>>) attributes {dimension_semantics = [#tpu.dimension_semantics<parallel>, #tpu.dimension_semantics<parallel>], iteration_bounds = array<i64: 2, 2>, scalar_prefetch = 0 : i64, scratch_operands = 2 : i64, tpu.core_type = #tpu.core_type<tc>, window_params = [{transform_indices = @transform_0, window_bounds = array<i64: 1, 1, 4, 7, 16, 8>}, {pipeline_mode = #tpu.pipeline_mode<synchronous>, transform_indices = @transform_1, window_bounds = array<i64: 72, 128>}, {pipeline_mode = #tpu.pipeline_mode<synchronous>, transform_indices = @transform_2, window_bounds = array<i64: 1, 128>}, {pipeline_mode = #tpu.pipeline_mode<synchronous>, transform_indices = @transform_3, window_bounds = array<i64: 9, 128>}, {pipeline_mode = #tpu.pipeline_mode<synchronous>, transform_indices = @transform_4, window_bounds = array<i64: 1, 128>}, {pipeline_mode = #tpu.pipeline_mode<synchronous>, transform_indices = @transform_5, window_bounds = array<i64: 128, 128>}, {pipeline_mode = #tpu.pipeline_mode<synchronous>, transform_indices = @transform_6, window_bounds = array<i64: 1, 128>}, {pipeline_mode = #tpu.pipeline_mode<synchronous>, transform_indices = @transform_7, window_bounds = array<i64: 8, 128>}, {pipeline_mode = #tpu.pipeline_mode<synchronous>, transform_indices = @transform_8, window_bounds = array<i64: 1, 128>}, {transform_indices = @transform_9, window_bounds = array<i64: 4>}, {transform_indices = @transform_10, window_bounds = array<i64: 1, 1, 32, 8>}]} {
    %c0 = arith.constant 0 : index
    %0 = memref.load %arg11[%c0] : memref<4xf32, #tpu.memory_space<smem>>
    %c1 = arith.constant 1 : index
    %1 = memref.load %arg11[%c1] : memref<4xf32, #tpu.memory_space<smem>>
    %c2 = arith.constant 2 : index
    %2 = memref.load %arg11[%c2] : memref<4xf32, #tpu.memory_space<smem>>
    %c3 = arith.constant 3 : index
    %3 = memref.load %arg11[%c3] : memref<4xf32, #tpu.memory_space<smem>>
    %c0_0 = arith.constant 0 : index
    %c0_1 = arith.constant 0 : index
    %c0_2 = arith.constant 0 : index
    %c0_3 = arith.constant 0 : index
    %c0_4 = arith.constant 0 : index
    %c0_5 = arith.constant 0 : index
    %4 = vector.load %arg2[%c0_0, %c0_1, %c0_2, %c0_3, %c0_4, %c0_5] : memref<1x1x4x7x16x8xbf16, #tpu.memory_space<vmem>>, vector<1x1x4x7x16x8xbf16>
    %5 = vector.shape_cast %4 : vector<1x1x4x7x16x8xbf16> to vector<4x7x16x8xbf16>
    %6 = arith.extf %5 : vector<4x7x16x8xbf16> to vector<4x7x16x8xf32>
    %7 = vector.extract_strided_slice %6 {offsets = [0, 0, 0, 0], sizes = [1, 6, 8, 8], strides = [1, 1, 1, 1]} : vector<4x7x16x8xf32> to vector<1x6x8x8xf32>
    %8 = vector.shape_cast %7 : vector<1x6x8x8xf32> to vector<6x8x8xf32>
    %c0_6 = arith.constant 0 : index
    %c0_7 = arith.constant 0 : index
    %c0_8 = arith.constant 0 : index
    %9 = vector.load %arg14[%c0_6, %c0_7, %c0_8] : memref<6x8x72xf32, #tpu.memory_space<vmem>>, vector<6x8x8xf32>
    tpu.vector_store %arg14[%c0_6, %c0_7, %c0_8], %8 {strides = array<i32>} : memref<6x8x72xf32, #tpu.memory_space<vmem>>, vector<6x8x8xf32>,
    %10 = vector.extract_strided_slice %6 {offsets = [1, 0, 0, 0], sizes = [1, 6, 8, 8], strides = [1, 1, 1, 1]} : vector<4x7x16x8xf32> to vector<1x6x8x8xf32>
    %11 = vector.shape_cast %10 : vector<1x6x8x8xf32> to vector<6x8x8xf32>
    %c0_9 = arith.constant 0 : index
    %c0_10 = arith.constant 0 : index
    %c8 = arith.constant 8 : index
    %12 = vector.load %arg14[%c0_9, %c0_10, %c8] : memref<6x8x72xf32, #tpu.memory_space<vmem>>, vector<6x8x8xf32>
    tpu.vector_store %arg14[%c0_9, %c0_10, %c8], %11 {strides = array<i32>} : memref<6x8x72xf32, #tpu.memory_space<vmem>>, vector<6x8x8xf32>,
    %13 = vector.extract_strided_slice %6 {offsets = [0, 0, 1, 0], sizes = [1, 6, 8, 8], strides = [1, 1, 1, 1]} : vector<4x7x16x8xf32> to vector<1x6x8x8xf32>
    %14 = vector.shape_cast %13 : vector<1x6x8x8xf32> to vector<6x8x8xf32>
    %c0_11 = arith.constant 0 : index
    %c0_12 = arith.constant 0 : index
    %c16 = arith.constant 16 : index
    %15 = vector.load %arg14[%c0_11, %c0_12, %c16] : memref<6x8x72xf32, #tpu.memory_space<vmem>>, vector<6x8x8xf32>
    tpu.vector_store %arg14[%c0_11, %c0_12, %c16], %14 {strides = array<i32>} : memref<6x8x72xf32, #tpu.memory_space<vmem>>, vector<6x8x8xf32>,
    %16 = vector.extract_strided_slice %6 {offsets = [2, 0, 0, 0], sizes = [1, 6, 8, 8], strides = [1, 1, 1, 1]} : vector<4x7x16x8xf32> to vector<1x6x8x8xf32>
    %17 = vector.shape_cast %16 : vector<1x6x8x8xf32> to vector<6x8x8xf32>
    %c0_13 = arith.constant 0 : index
    %c0_14 = arith.constant 0 : index
    %c24 = arith.constant 24 : index
    %18 = vector.load %arg14[%c0_13, %c0_14, %c24] : memref<6x8x72xf32, #tpu.memory_space<vmem>>, vector<6x8x8xf32>
    tpu.vector_store %arg14[%c0_13, %c0_14, %c24], %17 {strides = array<i32>} : memref<6x8x72xf32, #tpu.memory_space<vmem>>, vector<6x8x8xf32>,
    %19 = vector.extract_strided_slice %6 {offsets = [3, 0, 0, 0], sizes = [1, 6, 8, 8], strides = [1, 1, 1, 1]} : vector<4x7x16x8xf32> to vector<1x6x8x8xf32>
    %20 = vector.shape_cast %19 : vector<1x6x8x8xf32> to vector<6x8x8xf32>
    %c0_15 = arith.constant 0 : index
    %c0_16 = arith.constant 0 : index
    %c32 = arith.constant 32 : index
    %21 = vector.load %arg14[%c0_15, %c0_16, %c32] : memref<6x8x72xf32, #tpu.memory_space<vmem>>, vector<6x8x8xf32>
    tpu.vector_store %arg14[%c0_15, %c0_16, %c32], %20 {strides = array<i32>} : memref<6x8x72xf32, #tpu.memory_space<vmem>>, vector<6x8x8xf32>,
    %22 = vector.extract_strided_slice %6 {offsets = [2, 0, 1, 0], sizes = [1, 6, 8, 8], strides = [1, 1, 1, 1]} : vector<4x7x16x8xf32> to vector<1x6x8x8xf32>
    %23 = vector.shape_cast %22 : vector<1x6x8x8xf32> to vector<6x8x8xf32>
    %c0_17 = arith.constant 0 : index
    %c0_18 = arith.constant 0 : index
    %c40 = arith.constant 40 : index
    %24 = vector.load %arg14[%c0_17, %c0_18, %c40] : memref<6x8x72xf32, #tpu.memory_space<vmem>>, vector<6x8x8xf32>
    tpu.vector_store %arg14[%c0_17, %c0_18, %c40], %23 {strides = array<i32>} : memref<6x8x72xf32, #tpu.memory_space<vmem>>, vector<6x8x8xf32>,
    %25 = vector.extract_strided_slice %6 {offsets = [0, 1, 0, 0], sizes = [1, 6, 8, 8], strides = [1, 1, 1, 1]} : vector<4x7x16x8xf32> to vector<1x6x8x8xf32>
    %26 = vector.shape_cast %25 : vector<1x6x8x8xf32> to vector<6x8x8xf32>
    %c0_19 = arith.constant 0 : index
    %c0_20 = arith.constant 0 : index
    %c48 = arith.constant 48 : index
    %27 = vector.load %arg14[%c0_19, %c0_20, %c48] : memref<6x8x72xf32, #tpu.memory_space<vmem>>, vector<6x8x8xf32>
    tpu.vector_store %arg14[%c0_19, %c0_20, %c48], %26 {strides = array<i32>} : memref<6x8x72xf32, #tpu.memory_space<vmem>>, vector<6x8x8xf32>,
    %28 = vector.extract_strided_slice %6 {offsets = [1, 1, 0, 0], sizes = [1, 6, 8, 8], strides = [1, 1, 1, 1]} : vector<4x7x16x8xf32> to vector<1x6x8x8xf32>
    %29 = vector.shape_cast %28 : vector<1x6x8x8xf32> to vector<6x8x8xf32>
    %c0_21 = arith.constant 0 : index
    %c0_22 = arith.constant 0 : index
    %c56 = arith.constant 56 : index
    %30 = vector.load %arg14[%c0_21, %c0_22, %c56] : memref<6x8x72xf32, #tpu.memory_space<vmem>>, vector<6x8x8xf32>
    tpu.vector_store %arg14[%c0_21, %c0_22, %c56], %29 {strides = array<i32>} : memref<6x8x72xf32, #tpu.memory_space<vmem>>, vector<6x8x8xf32>,
    %31 = vector.extract_strided_slice %6 {offsets = [0, 1, 1, 0], sizes = [1, 6, 8, 8], strides = [1, 1, 1, 1]} : vector<4x7x16x8xf32> to vector<1x6x8x8xf32>
    %32 = vector.shape_cast %31 : vector<1x6x8x8xf32> to vector<6x8x8xf32>
    %c0_23 = arith.constant 0 : index
    %c0_24 = arith.constant 0 : index
    %c64 = arith.constant 64 : index
    %33 = vector.load %arg14[%c0_23, %c0_24, %c64] : memref<6x8x72xf32, #tpu.memory_space<vmem>>, vector<6x8x8xf32>
    tpu.vector_store %arg14[%c0_23, %c0_24, %c64], %32 {strides = array<i32>} : memref<6x8x72xf32, #tpu.memory_space<vmem>>, vector<6x8x8xf32>,
    %c0_25 = arith.constant 0 : index
    %c0_26 = arith.constant 0 : index
    %c0_27 = arith.constant 0 : index
    %34 = vector.load %arg14[%c0_25, %c0_26, %c0_27] : memref<6x8x72xf32, #tpu.memory_space<vmem>>, vector<6x8x72xf32>
    %35 = vector.shape_cast %34 : vector<6x8x72xf32> to vector<48x72xf32>
    %36 = arith.truncf %35 : vector<48x72xf32> to vector<48x72xbf16>
    %c0_28 = arith.constant 0 : index
    %c0_29 = arith.constant 0 : index
    %37 = vector.load %arg3[%c0_28, %c0_29] : memref<72x128xbf16, #tpu.memory_space<vmem>>, vector<72x128xbf16>
    %cst = arith.constant dense<0.000000e+00> : vector<48x128xf32>
    %38 = tpu.matmul %36, %37, %cst {dimension_numbers = #tpu.dot_dimension_numbers<[1], [0], [0], [1], [0, 0, 1, 1], [], []>} : vector<48x72xbf16>, vector<72x128xbf16>, vector<48x128xf32> -> vector<48x128xf32>
    %c0_30 = arith.constant 0 : index
    %c0_31 = arith.constant 0 : index
    %39 = vector.load %arg4[%c0_30, %c0_31] : memref<1x128xf32, #tpu.memory_space<vmem>>, vector<1x128xf32>
    %40 = vector.broadcast %39 : vector<1x128xf32> to vector<48x128xf32>
    %41 = arith.addf %38, %40 : vector<48x128xf32>
    %cst_32 = arith.constant 0.000000e+00 : f32
    %42 = vector.broadcast %cst_32 : f32 to vector<48x128xf32>
    %43 = arith.cmpf oge, %41, %42 : vector<48x128xf32>
    %44 = vector.broadcast %0 : f32 to vector<48x128xf32>
    %45 = arith.mulf %44, %41 : vector<48x128xf32>
    %46 = arith.select %43, %41, %45 : vector<48x128xi1>, vector<48x128xf32>
    %47 = tpu.iota {dimensions = array<i32: 0>} : vector<48x1xi32>
    %c0_i32 = arith.constant 0 : i32
    %48 = arith.cmpi sgt, %arg1, %c0_i32 : i32
    %c8_i32 = arith.constant 8 : i32
    %49 = vector.broadcast %c8_i32 : i32 to vector<48x1xi32>
    %50 = arith.cmpi sge, %47, %49 : vector<48x1xi32>
    %51 = vector.broadcast %48 : i1 to vector<48x1xi1>
    %52 = arith.ori %51, %50 : vector<48x1xi1>
    %c1_i32 = arith.constant 1 : i32
    %53 = arith.cmpi slt, %arg1, %c1_i32 : i32
    %c40_i32 = arith.constant 40 : i32
    %54 = vector.broadcast %c40_i32 : i32 to vector<48x1xi32>
    %55 = arith.cmpi slt, %47, %54 : vector<48x1xi32>
    %56 = vector.broadcast %53 : i1 to vector<48x1xi1>
    %57 = arith.ori %56, %55 : vector<48x1xi1>
    %58 = arith.andi %52, %57 : vector<48x1xi1>
    %cst_33 = arith.constant 0.000000e+00 : f32
    %59 = vector.shape_cast %58 : vector<48x1xi1> to vector<48x1xi1>
    %60 = vector.broadcast %59 : vector<48x1xi1> to vector<48x128xi1>
    %61 = vector.broadcast %cst_33 : f32 to vector<48x128xf32>
    %62 = arith.select %60, %46, %61 : vector<48x128xi1>, vector<48x128xf32>
    %cst_34 = arith.constant 0.000000e+00 : f32
    %63 = vector.broadcast %cst_34 : f32 to vector<6x1x128xf32>
    %c0_35 = arith.constant 0 : index
    %c0_36 = arith.constant 0 : index
    %c0_37 = arith.constant 0 : index
    %64 = vector.load %arg13[%c0_35, %c0_36, %c0_37] : memref<6x10x128xf32, #tpu.memory_space<vmem>>, vector<6x1x128xf32>
    tpu.vector_store %arg13[%c0_35, %c0_36, %c0_37], %63 {strides = array<i32>} : memref<6x10x128xf32, #tpu.memory_space<vmem>>, vector<6x1x128xf32>,
    %cst_38 = arith.constant 0.000000e+00 : f32
    %65 = vector.broadcast %cst_38 : f32 to vector<6x1x128xf32>
    %c0_39 = arith.constant 0 : index
    %c9 = arith.constant 9 : index
    %c0_40 = arith.constant 0 : index
    %66 = vector.load %arg13[%c0_39, %c9, %c0_40] : memref<6x10x128xf32, #tpu.memory_space<vmem>>, vector<6x1x128xf32>
    tpu.vector_store %arg13[%c0_39, %c9, %c0_40], %65 {strides = array<i32>} : memref<6x10x128xf32, #tpu.memory_space<vmem>>, vector<6x1x128xf32>,
    %67 = vector.shape_cast %62 : vector<48x128xf32> to vector<6x8x128xf32>
    %c0_41 = arith.constant 0 : index
    %c1_42 = arith.constant 1 : index
    %c0_43 = arith.constant 0 : index
    %68 = vector.load %arg13[%c0_41, %c1_42, %c0_43] : memref<6x10x128xf32, #tpu.memory_space<vmem>>, vector<6x8x128xf32>
    tpu.vector_store %arg13[%c0_41, %c1_42, %c0_43], %67 {strides = array<i32>} : memref<6x10x128xf32, #tpu.memory_space<vmem>>, vector<6x8x128xf32>,
    %c0_44 = arith.constant 0 : index
    %c0_45 = arith.constant 0 : index
    %c0_46 = arith.constant 0 : index
    %69 = vector.load %arg13[%c0_44, %c0_45, %c0_46] : memref<6x10x128xf32, #tpu.memory_space<vmem>>, vector<6x10x128xf32>
    %cst_47 = arith.constant 0.000000e+00 : f32
    %70 = vector.broadcast %cst_47 : f32 to vector<4x8x128xf32>
    %71 = vector.extract_strided_slice %69 {offsets = [0, 0, 0], sizes = [4, 8, 128], strides = [1, 1, 1]} : vector<6x10x128xf32> to vector<4x8x128xf32>
    %c0_48 = arith.constant 0 : index
    %c0_49 = arith.constant 0 : index
    %72 = vector.load %arg5[%c0_48, %c0_49] : memref<9x128xf32, #tpu.memory_space<vmem>>, vector<1x128xf32>
    %73 = vector.shape_cast %72 : vector<1x128xf32> to vector<1x1x128xf32>
    %74 = vector.broadcast %73 : vector<1x1x128xf32> to vector<4x8x128xf32>
    %75 = arith.mulf %71, %74 : vector<4x8x128xf32>
    %76 = arith.addf %70, %75 : vector<4x8x128xf32>
    %77 = vector.extract_strided_slice %69 {offsets = [0, 1, 0], sizes = [4, 8, 128], strides = [1, 1, 1]} : vector<6x10x128xf32> to vector<4x8x128xf32>
    %c1_50 = arith.constant 1 : index
    %c0_51 = arith.constant 0 : index
    %78 = vector.load %arg5[%c1_50, %c0_51] : memref<9x128xf32, #tpu.memory_space<vmem>>, vector<1x128xf32>
    %79 = vector.shape_cast %78 : vector<1x128xf32> to vector<1x1x128xf32>
    %80 = vector.broadcast %79 : vector<1x1x128xf32> to vector<4x8x128xf32>
    %81 = arith.mulf %77, %80 : vector<4x8x128xf32>
    %82 = arith.addf %76, %81 : vector<4x8x128xf32>
    %83 = vector.extract_strided_slice %69 {offsets = [0, 2, 0], sizes = [4, 8, 128], strides = [1, 1, 1]} : vector<6x10x128xf32> to vector<4x8x128xf32>
    %c2_52 = arith.constant 2 : index
    %c0_53 = arith.constant 0 : index
    %84 = vector.load %arg5[%c2_52, %c0_53] : memref<9x128xf32, #tpu.memory_space<vmem>>, vector<1x128xf32>
    %85 = vector.shape_cast %84 : vector<1x128xf32> to vector<1x1x128xf32>
    %86 = vector.broadcast %85 : vector<1x1x128xf32> to vector<4x8x128xf32>
    %87 = arith.mulf %83, %86 : vector<4x8x128xf32>
    %88 = arith.addf %82, %87 : vector<4x8x128xf32>
    %89 = vector.extract_strided_slice %69 {offsets = [1, 0, 0], sizes = [4, 8, 128], strides = [1, 1, 1]} : vector<6x10x128xf32> to vector<4x8x128xf32>
    %c3_54 = arith.constant 3 : index
    %c0_55 = arith.constant 0 : index
    %90 = vector.load %arg5[%c3_54, %c0_55] : memref<9x128xf32, #tpu.memory_space<vmem>>, vector<1x128xf32>
    %91 = vector.shape_cast %90 : vector<1x128xf32> to vector<1x1x128xf32>
    %92 = vector.broadcast %91 : vector<1x1x128xf32> to vector<4x8x128xf32>
    %93 = arith.mulf %89, %92 : vector<4x8x128xf32>
    %94 = arith.addf %88, %93 : vector<4x8x128xf32>
    %95 = vector.extract_strided_slice %69 {offsets = [1, 1, 0], sizes = [4, 8, 128], strides = [1, 1, 1]} : vector<6x10x128xf32> to vector<4x8x128xf32>
    %c4 = arith.constant 4 : index
    %c0_56 = arith.constant 0 : index
    %96 = vector.load %arg5[%c4, %c0_56] : memref<9x128xf32, #tpu.memory_space<vmem>>, vector<1x128xf32>
    %97 = vector.shape_cast %96 : vector<1x128xf32> to vector<1x1x128xf32>
    %98 = vector.broadcast %97 : vector<1x1x128xf32> to vector<4x8x128xf32>
    %99 = arith.mulf %95, %98 : vector<4x8x128xf32>
    %100 = arith.addf %94, %99 : vector<4x8x128xf32>
    %101 = vector.extract_strided_slice %69 {offsets = [1, 2, 0], sizes = [4, 8, 128], strides = [1, 1, 1]} : vector<6x10x128xf32> to vector<4x8x128xf32>
    %c5 = arith.constant 5 : index
    %c0_57 = arith.constant 0 : index
    %102 = vector.load %arg5[%c5, %c0_57] : memref<9x128xf32, #tpu.memory_space<vmem>>, vector<1x128xf32>
    %103 = vector.shape_cast %102 : vector<1x128xf32> to vector<1x1x128xf32>
    %104 = vector.broadcast %103 : vector<1x1x128xf32> to vector<4x8x128xf32>
    %105 = arith.mulf %101, %104 : vector<4x8x128xf32>
    %106 = arith.addf %100, %105 : vector<4x8x128xf32>
    %107 = vector.extract_strided_slice %69 {offsets = [2, 0, 0], sizes = [4, 8, 128], strides = [1, 1, 1]} : vector<6x10x128xf32> to vector<4x8x128xf32>
    %c6 = arith.constant 6 : index
    %c0_58 = arith.constant 0 : index
    %108 = vector.load %arg5[%c6, %c0_58] : memref<9x128xf32, #tpu.memory_space<vmem>>, vector<1x128xf32>
    %109 = vector.shape_cast %108 : vector<1x128xf32> to vector<1x1x128xf32>
    %110 = vector.broadcast %109 : vector<1x1x128xf32> to vector<4x8x128xf32>
    %111 = arith.mulf %107, %110 : vector<4x8x128xf32>
    %112 = arith.addf %106, %111 : vector<4x8x128xf32>
    %113 = vector.extract_strided_slice %69 {offsets = [2, 1, 0], sizes = [4, 8, 128], strides = [1, 1, 1]} : vector<6x10x128xf32> to vector<4x8x128xf32>
    %c7 = arith.constant 7 : index
    %c0_59 = arith.constant 0 : index
    %114 = vector.load %arg5[%c7, %c0_59] : memref<9x128xf32, #tpu.memory_space<vmem>>, vector<1x128xf32>
    %115 = vector.shape_cast %114 : vector<1x128xf32> to vector<1x1x128xf32>
    %116 = vector.broadcast %115 : vector<1x1x128xf32> to vector<4x8x128xf32>
    %117 = arith.mulf %113, %116 : vector<4x8x128xf32>
    %118 = arith.addf %112, %117 : vector<4x8x128xf32>
    %119 = vector.extract_strided_slice %69 {offsets = [2, 2, 0], sizes = [4, 8, 128], strides = [1, 1, 1]} : vector<6x10x128xf32> to vector<4x8x128xf32>
    %c8_60 = arith.constant 8 : index
    %c0_61 = arith.constant 0 : index
    %120 = vector.load %arg5[%c8_60, %c0_61] : memref<9x128xf32, #tpu.memory_space<vmem>>, vector<1x128xf32>
    %121 = vector.shape_cast %120 : vector<1x128xf32> to vector<1x1x128xf32>
    %122 = vector.broadcast %121 : vector<1x1x128xf32> to vector<4x8x128xf32>
    %123 = arith.mulf %119, %122 : vector<4x8x128xf32>
    %124 = arith.addf %118, %123 : vector<4x8x128xf32>
    %125 = vector.shape_cast %124 : vector<4x8x128xf32> to vector<32x128xf32>
    %c0_62 = arith.constant 0 : index
    %c0_63 = arith.constant 0 : index
    %126 = vector.load %arg6[%c0_62, %c0_63] : memref<1x128xf32, #tpu.memory_space<vmem>>, vector<1x128xf32>
    %127 = vector.broadcast %126 : vector<1x128xf32> to vector<32x128xf32>
    %128 = arith.addf %125, %127 : vector<32x128xf32>
    %129 = arith.truncf %128 : vector<32x128xf32> to vector<32x128xbf16>
    %c0_64 = arith.constant 0 : index
    %c0_65 = arith.constant 0 : index
    %130 = vector.load %arg7[%c0_64, %c0_65] : memref<128x128xbf16, #tpu.memory_space<vmem>>, vector<128x128xbf16>
    %cst_66 = arith.constant dense<0.000000e+00> : vector<32x128xf32>
    %131 = tpu.matmul %129, %130, %cst_66 {dimension_numbers = #tpu.dot_dimension_numbers<[1], [0], [0], [1], [0, 0, 1, 1], [], []>} : vector<32x128xbf16>, vector<128x128xbf16>, vector<32x128xf32> -> vector<32x128xf32>
    %c0_67 = arith.constant 0 : index
    %c0_68 = arith.constant 0 : index
    %132 = vector.load %arg8[%c0_67, %c0_68] : memref<1x128xf32, #tpu.memory_space<vmem>>, vector<1x128xf32>
    %133 = vector.broadcast %132 : vector<1x128xf32> to vector<32x128xf32>
    %134 = arith.addf %131, %133 : vector<32x128xf32>
    %cst_69 = arith.constant 0.000000e+00 : f32
    %135 = vector.broadcast %cst_69 : f32 to vector<32x128xf32>
    %136 = arith.cmpf oge, %134, %135 : vector<32x128xf32>
    %137 = vector.broadcast %2 : f32 to vector<32x128xf32>
    %138 = arith.mulf %137, %134 : vector<32x128xf32>
    %139 = arith.select %136, %134, %138 : vector<32x128xi1>, vector<32x128xf32>
    %140 = vector.shape_cast %6 : vector<4x7x16x8xf32> to vector<448x8xf32>
    %141 = arith.truncf %140 : vector<448x8xf32> to vector<448x8xbf16>
    %c0_70 = arith.constant 0 : index
    %c0_71 = arith.constant 0 : index
    %142 = vector.load %arg9[%c0_70, %c0_71] : memref<8x128xbf16, #tpu.memory_space<vmem>>, vector<8x128xbf16>
    %cst_72 = arith.constant dense<0.000000e+00> : vector<448x128xf32>
    %143 = tpu.matmul %141, %142, %cst_72 {dimension_numbers = #tpu.dot_dimension_numbers<[1], [0], [0], [1], [0, 0, 1, 1], [], []>} : vector<448x8xbf16>, vector<8x128xbf16>, vector<448x128xf32> -> vector<448x128xf32>
    %c0_73 = arith.constant 0 : index
    %c0_74 = arith.constant 0 : index
    %144 = vector.load %arg10[%c0_73, %c0_74] : memref<1x128xf32, #tpu.memory_space<vmem>>, vector<1x128xf32>
    %145 = vector.broadcast %144 : vector<1x128xf32> to vector<448x128xf32>
    %146 = arith.addf %143, %145 : vector<448x128xf32>
    %cst_75 = arith.constant 0.000000e+00 : f32
    %147 = vector.broadcast %cst_75 : f32 to vector<448x128xf32>
    %148 = arith.cmpf oge, %146, %147 : vector<448x128xf32>
    %149 = vector.broadcast %1 : f32 to vector<448x128xf32>
    %150 = arith.mulf %149, %146 : vector<448x128xf32>
    %151 = arith.select %148, %146, %150 : vector<448x128xi1>, vector<448x128xf32>
    %152 = vector.shape_cast %151 : vector<448x128xf32> to vector<4x7x16x128xf32>
    %153 = vector.extract_strided_slice %152 {offsets = [0, 1, 0, 0], sizes = [1, 4, 8, 128], strides = [1, 1, 1, 1]} : vector<4x7x16x128xf32> to vector<1x4x8x128xf32>
    %154 = vector.shape_cast %153 : vector<1x4x8x128xf32> to vector<4x8x128xf32>
    %155 = vector.extract_strided_slice %152 {offsets = [1, 1, 0, 0], sizes = [1, 4, 8, 128], strides = [1, 1, 1, 1]} : vector<4x7x16x128xf32> to vector<1x4x8x128xf32>
    %156 = vector.shape_cast %155 : vector<1x4x8x128xf32> to vector<4x8x128xf32>
    %157 = arith.maximumf %154, %156 : vector<4x8x128xf32>
    %158 = vector.extract_strided_slice %152 {offsets = [0, 1, 1, 0], sizes = [1, 4, 8, 128], strides = [1, 1, 1, 1]} : vector<4x7x16x128xf32> to vector<1x4x8x128xf32>
    %159 = vector.shape_cast %158 : vector<1x4x8x128xf32> to vector<4x8x128xf32>
    %160 = arith.maximumf %157, %159 : vector<4x8x128xf32>
    %161 = vector.extract_strided_slice %152 {offsets = [2, 1, 0, 0], sizes = [1, 4, 8, 128], strides = [1, 1, 1, 1]} : vector<4x7x16x128xf32> to vector<1x4x8x128xf32>
    %162 = vector.shape_cast %161 : vector<1x4x8x128xf32> to vector<4x8x128xf32>
    %163 = arith.maximumf %160, %162 : vector<4x8x128xf32>
    %164 = vector.extract_strided_slice %152 {offsets = [3, 1, 0, 0], sizes = [1, 4, 8, 128], strides = [1, 1, 1, 1]} : vector<4x7x16x128xf32> to vector<1x4x8x128xf32>
    %165 = vector.shape_cast %164 : vector<1x4x8x128xf32> to vector<4x8x128xf32>
    %166 = arith.maximumf %163, %165 : vector<4x8x128xf32>
    %167 = vector.extract_strided_slice %152 {offsets = [2, 1, 1, 0], sizes = [1, 4, 8, 128], strides = [1, 1, 1, 1]} : vector<4x7x16x128xf32> to vector<1x4x8x128xf32>
    %168 = vector.shape_cast %167 : vector<1x4x8x128xf32> to vector<4x8x128xf32>
    %169 = arith.maximumf %166, %168 : vector<4x8x128xf32>
    %170 = vector.extract_strided_slice %152 {offsets = [0, 2, 0, 0], sizes = [1, 4, 8, 128], strides = [1, 1, 1, 1]} : vector<4x7x16x128xf32> to vector<1x4x8x128xf32>
    %171 = vector.shape_cast %170 : vector<1x4x8x128xf32> to vector<4x8x128xf32>
    %172 = arith.maximumf %169, %171 : vector<4x8x128xf32>
    %173 = vector.extract_strided_slice %152 {offsets = [1, 2, 0, 0], sizes = [1, 4, 8, 128], strides = [1, 1, 1, 1]} : vector<4x7x16x128xf32> to vector<1x4x8x128xf32>
    %174 = vector.shape_cast %173 : vector<1x4x8x128xf32> to vector<4x8x128xf32>
    %175 = arith.maximumf %172, %174 : vector<4x8x128xf32>
    %176 = vector.extract_strided_slice %152 {offsets = [0, 2, 1, 0], sizes = [1, 4, 8, 128], strides = [1, 1, 1, 1]} : vector<4x7x16x128xf32> to vector<1x4x8x128xf32>
    %177 = vector.shape_cast %176 : vector<1x4x8x128xf32> to vector<4x8x128xf32>
    %178 = arith.maximumf %175, %177 : vector<4x8x128xf32>
    %179 = vector.shape_cast %178 : vector<4x8x128xf32> to vector<32x128xf32>
    %180 = arith.addf %139, %179 : vector<32x128xf32>
    %cst_76 = arith.constant 0.000000e+00 : f32
    %181 = vector.broadcast %cst_76 : f32 to vector<32x128xf32>
    %182 = arith.cmpf oge, %180, %181 : vector<32x128xf32>
    %183 = vector.broadcast %3 : f32 to vector<32x128xf32>
    %184 = arith.mulf %183, %180 : vector<32x128xf32>
    %185 = arith.select %182, %180, %184 : vector<32x128xi1>, vector<32x128xf32>
    %186 = vector.extract_strided_slice %185 {offsets = [0, 0], sizes = [32, 8], strides = [1, 1]} : vector<32x128xf32> to vector<32x8xf32>
    %c0_77 = arith.constant 0 : index
    %c0_78 = arith.constant 0 : index
    %c0_79 = arith.constant 0 : index
    %c0_80 = arith.constant 0 : index
    %187 = vector.load %arg12[%c0_77, %c0_78, %c0_79, %c0_80] : memref<1x1x32x8xf32, #tpu.memory_space<vmem>>, vector<1x1x32x8xf32>
    %188 = vector.shape_cast %187 : vector<1x1x32x8xf32> to vector<32x8xf32>
    %189 = vector.shape_cast %186 : vector<32x8xf32> to vector<1x1x32x8xf32>
    tpu.vector_store %arg12[%c0_77, %c0_78, %c0_79, %c0_80], %189 {strides = array<i32>} : memref<1x1x32x8xf32, #tpu.memory_space<vmem>>, vector<1x1x32x8xf32>,
    return
  }
  func.func @transform_0(%arg0: i32, %arg1: i32) -> (i32, i32, i32, i32, i32, i32) {
    %c0_i32 = arith.constant 0 : i32
    %c0_i32_0 = arith.constant 0 : i32
    %c0_i32_1 = arith.constant 0 : i32
    %c0_i32_2 = arith.constant 0 : i32
    %c0_i32_3 = arith.constant 0 : i32
    return %arg0, %arg1, %c0_i32, %c0_i32_0, %c0_i32_1, %c0_i32_2 : i32, i32, i32, i32, i32, i32
  }
  func.func @transform_1(%arg0: i32, %arg1: i32) -> (i32, i32) {
    %c0_i32 = arith.constant 0 : i32
    %c0_i32_0 = arith.constant 0 : i32
    %c0_i32_1 = arith.constant 0 : i32
    return %c0_i32, %c0_i32_0 : i32, i32
  }
  func.func @transform_2(%arg0: i32, %arg1: i32) -> (i32, i32) {
    %c0_i32 = arith.constant 0 : i32
    %c0_i32_0 = arith.constant 0 : i32
    %c0_i32_1 = arith.constant 0 : i32
    return %c0_i32, %c0_i32_0 : i32, i32
  }
  func.func @transform_3(%arg0: i32, %arg1: i32) -> (i32, i32) {
    %c0_i32 = arith.constant 0 : i32
    %c0_i32_0 = arith.constant 0 : i32
    %c0_i32_1 = arith.constant 0 : i32
    return %c0_i32, %c0_i32_0 : i32, i32
  }
  func.func @transform_4(%arg0: i32, %arg1: i32) -> (i32, i32) {
    %c0_i32 = arith.constant 0 : i32
    %c0_i32_0 = arith.constant 0 : i32
    %c0_i32_1 = arith.constant 0 : i32
    return %c0_i32, %c0_i32_0 : i32, i32
  }
  func.func @transform_5(%arg0: i32, %arg1: i32) -> (i32, i32) {
    %c0_i32 = arith.constant 0 : i32
    %c0_i32_0 = arith.constant 0 : i32
    %c0_i32_1 = arith.constant 0 : i32
    return %c0_i32, %c0_i32_0 : i32, i32
  }
  func.func @transform_6(%arg0: i32, %arg1: i32) -> (i32, i32) {
    %c0_i32 = arith.constant 0 : i32
    %c0_i32_0 = arith.constant 0 : i32
    %c0_i32_1 = arith.constant 0 : i32
    return %c0_i32, %c0_i32_0 : i32, i32
  }
  func.func @transform_7(%arg0: i32, %arg1: i32) -> (i32, i32) {
    %c0_i32 = arith.constant 0 : i32
    %c0_i32_0 = arith.constant 0 : i32
    %c0_i32_1 = arith.constant 0 : i32
    return %c0_i32, %c0_i32_0 : i32, i32
  }
  func.func @transform_8(%arg0: i32, %arg1: i32) -> (i32, i32) {
    %c0_i32 = arith.constant 0 : i32
    %c0_i32_0 = arith.constant 0 : i32
    %c0_i32_1 = arith.constant 0 : i32
    return %c0_i32, %c0_i32_0 : i32, i32
  }
  func.func @transform_9(%arg0: i32, %arg1: i32) -> i32 {
    %c0_i32 = arith.constant 0 : i32
    %c0_i32_0 = arith.constant 0 : i32
    return %c0_i32 : i32
  }
  func.func @transform_10(%arg0: i32, %arg1: i32) -> (i32, i32, i32, i32) {
    %c0_i32 = arith.constant 0 : i32
    %c0_i32_0 = arith.constant 0 : i32
    %c0_i32_1 = arith.constant 0 : i32
    return %arg0, %arg1, %c0_i32, %c0_i32_0 : i32, i32, i32, i32
  }
}

</mosaic_0001>

<bundles_post_ra>
// kernel: tpu_custom_call.1
= control target key start
LH: loop header
LB: loop body
LE: loop exit
PB: predicated region body
PF: predicated region fallthrough
CT: control target
= control target key end

     0   :  { %15 = vsyncpa [#allocation5], 0  ;;  %s2588_s13 = smov 0   ;;  %s2590_s14 = smov 0   ;;  %s3312_s0 = inlined_call_operand.vmem [shape: bf16[2,2,4,7,16,8], index: 0, kind: input, shape index: {}]   ;;  %s3313_s1 = inlined_call_operand.vmem [shape: bf16[72,128], index: 1, kind: input, shape index: {}]   ;;  %s3314_s2 = inlined_call_operand.vmem [shape: f32[1,128], index: 2, kind: input, shape index: {}]   ;;  %s3315_s3 = inlined_call_operand.vmem [shape: f32[9,128], index: 3, kind: input, shape index: {}]   ;;  %s3316_s4 = inlined_call_operand.vmem [shape: f32[1,128], index: 4, kind: input, shape index: {}]   ;;  %s3317_s5 = inlined_call_operand.vmem [shape: bf16[128,128], index: 5, kind: input, shape index: {}]   ;;  %s3318_s6 = inlined_call_operand.vmem [shape: f32[1,128], index: 6, kind: input, shape index: {}]   ;;  %s3319_s7 = inlined_call_operand.vmem [shape: bf16[8,128], index: 7, kind: input, shape index: {}]   ;;  %s3320_s8 = inlined_call_operand.vmem [shape: f32[1,128], index: 8, kind: input, shape index: {}]   ;;  %s3321_s9 = inlined_call_operand.vmem [shape: f32[4], index: 9, kind: input, shape index: {}]   ;;  %s3322_s10 = inlined_call_operand.vmem [shape: f32[2,2,32,8], index: 10, kind: output, shape index: {}]  }
   0x1   :  { %s2592_s15 = smov 0   ;;  %s2594_s16 = smov 0  }
   0x2   :  { %s2596_s17 = smov 0  }
   0x3 LB: > { %s1954_s18 = sadd.s32 4294967295, %s2521_s17   ;;  %s30_s19 = sadd.s32 1, %s2513_s15  ;;  %s2521_s17 = sphi %s2596_s17, %s21_s17   ;;  %s2517_s16 = sphi %s2594_s16, %s3326_s16   ;;  %s2513_s15 = sphi %s2592_s15, %s3325_s15   ;;  %s2509_s14 = sphi %s2590_s14, %s3324_s14   ;;  %s2505_s13 = sphi %s2588_s13, %s3323_s13  }
   0x4   : > { %p31_p0 = scmp.ge.s32.totalorder %s30_s19, 2  ;;  %s33_s20 = sadd.s32 1, %s2517_s16 }
   0x5   : > { %p1956_p1 = scmp.ge.s32.totalorder %s2521_s17, 1  ;;  %p283_p2 = scmp.lt.s32.totalorder %s2521_s17, 5 }
   0x6   : > { %s3328_s19 = smov (%p31_p0, %s30_s19), 0  ;;  %s3330_s20 = smov (!%p31_p0, %s33_s20), %s2517_s16 }
   0x7   : > { %p284_p3 = pnand %p1956_p1, %p283_p2  ;;  %p35_p4 = scmp.ge.s32.totalorder %s3330_s20, 2 }
   0x8   : > { %p2221_p5 = scmp.eq.s32.totalorder %s1954_s18, 0  ;;  %s319_s23 = sshll.u32 %s3321_s9, 4  ;;  %s320_s23 = int_to_ptr.vmem [resolvable:$true] %s319_s23 }
   0x9   : > { %p2217_p6 = pneg %p284_p3  ;;  %s3332_s20 = smov (%p35_p4, %s3330_s20), 0 }
   0xa   : > { %s2523_s24 = smov [#allocation4]   ;;  %344 = sbr.rel (%p284_p3) target bundleno = 655 (0x28f), region = 60 }
   0xb   : > { %p2218_p7 = pnand %p2221_p5, %p2217_p6 }
   0xd   : > { %2220 = dma.vmem_to_smem (!%p2218_p7), %s320_s23, 16, %s2523_s24, [#allocation5]  }
   0xf   : > { %2500 = dma.done.wait (%p2221_p5), [#allocation5], 16  }
  0x10   : > { %2502 = vsyncadd (%p2221_p5), [#allocation5], 4294967280 }
  0x11   : > { %351 = sfence }
  0x12   : > { %p392_p8 = scmp.lt.s32.totalorder %s2509_s14, 1  ;;  %p394_p9 = scmp.lt.s32.totalorder %s2505_s13, 1  ;;  %vm527_vm0 = vcmask 64512   ;;  %vm907_vm1 = vcmask 1043456   ;;  %vm558_vm2 = vcmask 130112   ;;  %vm613_vm3 = vcmask 195713  }
  0x13   : > { %s2524_s18 = smov 8   ;;  %s2525_s21 = smov 16   ;;  %vm615_vm4 = vcmask 188544   ;;  %vm651_vm5 = vcmask 261312   ;;  %vm682_vm6 = vcmask 326912   ;;  %vm731_vm7 = vcmask 392513  }
  0x14   : > { %s3334_s14 = smov (!%p392_p8, %s2509_s14), 1  ;;  %s2526_s22 = smov 32   ;;  %vm733_vm8 = vcmask 385344   ;;  %vm764_vm9 = vcmask 458112   ;;  %vm790_vm10 = vcmask 523712   ;;  %vm834_vm11 = vcmask 589313  }
  0x15   : > { %s2630_s25 = scalar_select %p394_p9, %s2505_s13, 1  ;;  %vm836_vm12 = vcmask 582144   ;;  %vm897_vm13 = vcmask 588800  }
  0x16   : > { %s2212_s26 = smul.u32 112, %s3334_s14  ;;  %s2527_s23 = smov 24  }
  0x17   : > { %s2211_s27 = smul.u32 56, %s2630_s25  ;;  %s2528_s24 = smov 40  }
  0x18   : > { %s411_s30 = sld [smem:[#allocation4]]  ;;  %p961_p10 = scmp.gt.s32.totalorder %s2505_s13, 0 }
  0x19   : > { %s398_s28 = sadd.s32 %s2212_s26, %s2211_s27  ;;  %s2529_s26 = smov 48  }
  0x1a   : > { %s1961_s29 = sshll.u32 %s398_s28, 2  ;;  %s2530_s27 = smov 56  }
  0x1b   : > { %s2637_s12 = scalar_lea.vmem %s3312_s0, %s1961_s29  ;;  %s2531_s28 = smov 64  }
  0x1c   : > { %v2181_v0 = vld [vmem:[%s2637_s12 + $0x38] sm:$0xff]   ;;  %v2182_v1 = vld [vmem:[%s2637_s12 + $0x40] sm:$0xff]   ;;  %v2175_v2 = vld [vmem:[%s2637_s12 + $0x8] sm:$0xff]   ;;  %s968_s11 = scalar_select %p961_p10, 1, 0 }
  0x1d   : > { %v2101_v3 = vunpack.c.l.bf16 %v2181_v0  ;;  %v2105_v4 = vunpack.c.l.bf16 %v2182_v1  ;;  %v2077_v5 = vunpack.c.l.bf16 %v2175_v2  ;;  %v2078_v6 = vunpack.c.h.bf16 %v2175_v2  ;;  %v2643_v7 = vld [vmem:[%s2637_s12 + $0x70] sm:$0xff]   ;;  %v2646_v8 = vld [vmem:[%s2637_s12 + $0x78] sm:$0xff]   ;;  %v2072_v9 = vld [vmem:[%s2637_s12] sm:$0xff]   ;;  %s1965_s13 = sld [smem:[#allocation4 + $0x1]] }
  0x1e   : > { %v2073_v10 = vunpack.c.l.bf16 %v2072_v9  ;;  %v2176_v11 = vld [vmem:[%s2637_s12 + $0x10] sm:$0xff]   ;;  %v2651_v12 = vld [vmem:[%s2637_s12 + $0xa8] sm:$0xff]   ;;  %v2177_v17 = vld [vmem:[%s2637_s12 + $0x18] sm:$0xff]   ;;  %v2129_v18 = vunpack.c.l.bf16 %v2643_v7  ;;  %v2133_v19 = vunpack.c.l.bf16 %v2646_v8  ;;  %v2074_v20 = vunpack.c.h.bf16 %v2072_v9  ;;  %s1966_s29 = sld [smem:[#allocation4 + $0x2]] }
  0x1f   : > { %v2654_v13 = vld [vmem:[%s2637_s12 + $0xb0] sm:$0xff]   ;;  %v2273_v14 = vpack.i.bf16 %v2105_v4, %v2101_v3  ;;  %v2283_v15 = vpack.i.bf16 %v2078_v6, %v2077_v5  ;;  %529 = vst.msk [vmem:[#allocation3 + $0x8] sm:$0xff] %vm527_vm0, %v2077_v5  ;;  %v2081_v16 = vunpack.c.l.bf16 %v2176_v11  ;;  %v2153_v21 = vunpack.c.l.bf16 %v2651_v12  ;;  %v2183_v30 = vld [vmem:[%s2637_s12 + $0x48] sm:$0xff]   ;;  %v2178_v31 = vld [vmem:[%s2637_s12 + $0x20] sm:$0xff]  }
  0x20   : > { %528 = vst.msk [vmem:[#allocation3] sm:$0xff] %vm527_vm0, %v2073_v10  ;;  %v2157_v22 = vunpack.c.l.bf16 %v2654_v13  ;;  %v2666_v23 = vunpack.c.l.bf16 %v2177_v17  ;;  %v2288_v25 = vpack.i.bf16 %v2133_v19, %v2129_v18  ;;  %v2278_v26 = vpack.i.bf16 %v2074_v20, %v2073_v10  ;;  %v2682_v38 = vld [vmem:[%s2637_s12 + $0x50] sm:$0xff]   ;;  %v2689_v43 = vld [vmem:[%s2637_s12 + $0x88] sm:$0xff]   ;;  %v2692_v44 = vld [vmem:[%s2637_s12 + $0x80] sm:$0xff]  }
  0x21   : > { %2274 = vrot.lane.b32.xlu0 %v2273_v14, %s2524_s18  ;;  %2284 = vrot.lane.b32.xlu1 %v2283_v15, %s2525_s21  ;;  %530 = vst.msk [vmem:[#allocation3 + $0x10] sm:$0xff] %vm527_vm0, %v2081_v16  ;;  %v2130_v27 = vunpack.c.h.bf16 %v2643_v7  ;;  %v2134_v28 = vunpack.c.h.bf16 %v2646_v8  ;;  %v2308_v32 = vpack.i.bf16 %v2081_v16, %v2077_v5  ;;  %v2109_v34 = vunpack.c.l.bf16 %v2183_v30  ;;  %v2179_v45 = vld [vmem:[%s2637_s12 + $0x28] sm:$0xff]   ;;  %v2699_v49 = vld [vmem:[%s2637_s12 + $0xb8] sm:$0xff]  }
  0x22   : > { %v2293_v24 = vpack.i.bf16 %v2157_v22, %v2153_v21  ;;  %531 = vst.msk [vmem:[#allocation3 + $0x18] sm:$0xff] %vm527_vm0, %v2666_v23  ;;  %v2089_v35 = vunpack.c.l.bf16 %v2178_v31  ;;  %v2082_v36 = vunpack.c.h.bf16 %v2176_v11  ;;  %v2113_v40 = vunpack.c.l.bf16 %v2682_v38  ;;  %v2197_v50 = vld [vmem:[%s2637_s12 + $0xc0] sm:$0xff]   ;;  %v2711_v59 = vld [vmem:[%s2637_s12 + $0x58] sm:$0xff]   ;;  %v2726_v5 = vld [vmem:[%s2637_s12 + $0x90] sm:$0xff]  }
  0x23   : > { %v2298_v29 = vpack.i.bf16 %v2130_v27, %v2129_v18  ;;  %v2303_v33 = vpack.i.bf16 %v2134_v28, %v2133_v19  ;;  %v2313_v37 = vpack.i.bf16 %v2109_v34, %v2105_v4  ;;  %v2086_v41 = vunpack.c.h.bf16 %v2177_v17  ;;  %v2719_v0 = vld [vmem:[%s2637_s12 + $0x60] sm:$0xff]   ;;  %v2193_v6 = vld [vmem:[%s2637_s12 + $0x98] sm:$0xff]   ;;  %v2198_v14 = vld [vmem:[%s2637_s12 + $0xc8] sm:$0xff]  }
  0x24   : > { %2294 = vrot.lane.b32.xlu2 %v2293_v24, %s2526_s22  ;;  %532 = vst.msk [vmem:[#allocation3 + $0x20] sm:$0xff] %vm527_vm0, %v2089_v35  ;;  %v2323_v39 = vpack.i.bf16 %v2082_v36, %v2081_v16  ;;  %v2328_v42 = vpack.i.bf16 %v2113_v40, %v2109_v34  ;;  %v2141_v47 = vunpack.c.l.bf16 %v2689_v43  ;;  %v2093_v48 = vunpack.c.l.bf16 %v2179_v45  ;;  %v2741_v27 = vld [vmem:[%s2637_s12 + $0x68] sm:$0xff]   ;;  %v865_v34 = vld [vmem:[%s3313_s1 + $0x20] sm:$0xf] }
  0x25   : > { %v2338_v46 = vpack.i.bf16 %v2086_v41, %v2666_v23  ;;  %v2137_v51 = vunpack.c.l.bf16 %v2692_v44  ;;  %v2138_v52 = vunpack.c.h.bf16 %v2692_v44  ;;  %v2161_v53 = vunpack.c.l.bf16 %v2699_v49  ;;  %v2062_v41 = vld [vmem:[%s3313_s1 + $0x18] sm:$0xff] }
  0x26   : > { %533 = vst.msk [vmem:[#allocation3 + $0x28] sm:$0xff] %vm527_vm0, %v2093_v48  ;;  %v2165_v54 = vunpack.c.l.bf16 %v2197_v50  ;;  %v2142_v58 = vunpack.c.h.bf16 %v2689_v43  ;;  %v2117_v60 = vunpack.c.l.bf16 %v2711_v59  ;;  %v2363_v63 = vpack.i.bf16 %v2089_v35, %v2666_v23  ;;  %v2180_v23 = vld [vmem:[%s2637_s12 + $0x30] sm:$0xff]   ;;  %v2060_v50 = vld [vmem:[%s3313_s1 + $0x8] sm:$0xff] }
  0x27   : > { %v2343_v55 = vpack.i.bf16 %v2141_v47, %v2137_v51  ;;  %v2353_v56 = vpack.i.bf16 %v2138_v52, %v2137_v51  ;;  %v2121_v1 = vunpack.c.l.bf16 %v2719_v0  ;;  %v2090_v2 = vunpack.c.h.bf16 %v2178_v31 }
  0x28   : > { %v2348_v57 = vpack.i.bf16 %v2165_v54, %v2161_v53  ;;  %v2358_v61 = vpack.i.bf16 %v2142_v58, %v2141_v47  ;;  %v2368_v62 = vpack.i.bf16 %v2117_v60, %v2113_v40  ;;  %v2145_v9 = vunpack.c.l.bf16 %v2726_v5  ;;  %v1445_v40 = vld [vmem:[%s3319_s7] sm:$0xf] }
  0x29   : > { %2289 = vrot.lane.b32.xlu1 %v2288_v25, %s2527_s23  ;;  %2279 = vrot.lane.b32.xlu0 %v2278_v26, %s2525_s21  ;;  %v2383_v3 = vpack.i.bf16 %v2121_v1, %v2117_v60  ;;  %v2378_v4 = vpack.i.bf16 %v2090_v2, %v2089_v35  ;;  %v2149_v10 = vunpack.c.l.bf16 %v2193_v6  ;;  %v2094_v11 = vunpack.c.h.bf16 %v2179_v45 }
  0x2a   : > { %v2169_v18 = vunpack.c.l.bf16 %v2198_v14  ;;  %v2150_v20 = vunpack.c.h.bf16 %v2193_v6  ;;  %v2146_v21 = vunpack.c.h.bf16 %v2726_v5  ;;  %v2097_v26 = vunpack.c.l.bf16 %v2180_v23 }
  0x2b   : > { %v2398_v16 = vpack.i.bf16 %v2149_v10, %v2145_v9  ;;  %v2393_v17 = vpack.i.bf16 %v2094_v11, %v2093_v48  ;;  %v2125_v28 = vunpack.c.l.bf16 %v2741_v27  ;;  %v2098_v31 = vunpack.c.h.bf16 %v2180_v23 }
  0x2c   : > { %2299 = vrot.lane.b32.xlu2 %v2298_v29, %s2528_s24  ;;  %v2413_v24 = vpack.i.bf16 %v2150_v20, %v2149_v10  ;;  %v2408_v25 = vpack.i.bf16 %v2146_v21, %v2145_v9  ;;  %v2418_v29 = vpack.i.bf16 %v2097_v26, %v2093_v48  ;;  %v887_v35 = vunpack.c.l.b16 %v865_v34 }
  0x2d   : > { %v2423_v30 = vpack.i.bf16 %v2125_v28, %v2121_v1 }
  0x31   : > { %2309 = vrot.lane.b32.xlu1 %v2308_v32, %s2529_s26  ;;  %2304 = vrot.lane.b32.xlu0 %v2303_v33, %s2528_s24  ;;  %v2433_v32 = vpack.i.bf16 %v2098_v31, %v2097_v26 }
  0x34   : > { %2314 = vrot.lane.b32.xlu2 %v2313_v37, %s2530_s27  ;;  %v892_v37 = vpack.c.b16 %v887_v35, %v887_v35 }
  0x39   : > { %2324 = vrot.lane.b32.xlu1 %v2323_v39, %s2531_s28  ;;  %2319 = vrot.lane.b32.xlu0 %v2283_v15, %s2531_s28  ;;  %v2199_v15 = vld [vmem:[%s2637_s12 + $0xd0] sm:$0xff]  }
  0x3a   : > { %v2173_v19 = vunpack.c.l.bf16 %v2199_v15 }
  0x3c   : > { %2329 = vrot.lane.b32.xlu2 %v2328_v42, %s2524_s18  ;;  %v2403_v22 = vpack.i.bf16 %v2173_v19, %v2169_v18  ;;  %v2761_v42 = vsel %vm907_vm1, %v1445_v40, 0 }
  0x3d   : > { %2209 = vmatpush.bf16.msra.mxu2 %v2761_v42  ;;  %2210 = vmatpush.bf16.msra.mxu3 %v2761_v42 }
  0x40   : > { %2037 = vmatmul.msk.bf16.vlgmr.msra.gmra.mxu2 %vm527_vm0, %v2682_v38  ;;  %2046 = vmatmul.msk.bf16.vlgmr.msra.gmra.mxu3 %vm527_vm0, %v2193_v6 }
  0x41   : > { %2339 = vrot.lane.b32.xlu1 %v2338_v46, %s2525_s21  ;;  %2334 = vrot.lane.b32.xlu0 %v2323_v39, %s2525_s21  ;;  %v909_v39 = vsel %vm907_vm1, %v892_v37, 0 }
  0x42   : > { %914 = vmatpush.bf16.msra.mxu0 %v909_v39 }
  0x44   : > { %2344 = vrot.lane.b32.xlu2 %v2343_v55, %s2527_s23 }
  0x46   : > { %915 = vmatpush.bf16.msra.mxu0 %v2062_v41 }
  0x49   : > { %2354 = vrot.lane.b32.xlu1 %v2353_v56, %s2528_s24  ;;  %2349 = vrot.lane.b32.xlu0 %v2348_v57, %s2526_s22  ;;  %v2059_v57 = vld [vmem:[%s3313_s1] sm:$0xff] }
  0x4c   : > { %2359 = vrot.lane.b32.xlu2 %v2358_v61, %s2528_s24 }
  0x50   : > { %2038 = vmatmul.msk.bf16.gmra.mxu2 %vm527_vm0, %v2711_v59 }
  0x51   : > { %2369 = vrot.lane.b32.xlu1 %v2368_v62, %s2530_s27  ;;  %2364 = vrot.lane.b32.xlu0 %v2363_v63, %s2529_s26 }
  0x54   : > { %2374 = vrot.lane.b32.xlu2 %v2338_v46, %s2531_s28  ;;  %v2061_v46 = vld [vmem:[%s3313_s1 + $0x10] sm:$0xff] }
  0x55   : > { %916 = vmatpush.bf16.msra.mxu0 %v2061_v46 }
  0x59   : > { %2384 = vrot.lane.b32.xlu1 %v2383_v3, %s2524_s18  ;;  %2379 = vrot.lane.b32.xlu0 %v2378_v4, %s2531_s28  ;;  %s1962_s18 = sshll.u32 %s2630_s25, 2 }
  0x5a   : > { %917 = vmatpush.bf16.msra.mxu0 %v2060_v50 }
  0x5c   : > { %2389 = vrot.lane.b32.xlu2 %v2378_v4, %s2525_s21 }
  0x5e   : > { %918 = vmatpush.bf16.msra.mxu0 %v2059_v57 }
  0x60   : > { %2039 = vmatmul.msk.bf16.gmra.mxu2 %vm527_vm0, %v2719_v0 }
  0x61   : > { %2399 = vrot.lane.b32.xlu1 %v2398_v16, %s2527_s23  ;;  %2394 = vrot.lane.b32.xlu0 %v2393_v17, %s2525_s21  ;;  %s3011_s23 = scalar_select %p394_p9, 1, 0 }
  0x62   : > { %s1963_s21 = sshll.u32 %s3334_s14, 3 }
  0x64   : > { %2404 = vrot.lane.b32.xlu2 %v2403_v22, %s2526_s22  ;;  %s407_s22 = sadd.s32 %s1963_s21, %s1962_s18 }
  0x65   : > { %s1964_s14 = sshll.u32 %s407_s22, 3 }
  0x69   : > { %2414 = vrot.lane.b32.xlu1 %v2413_v24, %s2528_s24  ;;  %2409 = vrot.lane.b32.xlu0 %v2408_v25, %s2528_s24  ;;  %s3248_s24 = scalar_lea.vmem %s3322_s10, %s1964_s14 }
  0x6c   : > { %2419 = vrot.lane.b32.xlu2 %v2418_v29, %s2529_s26 }
  0x70   : > { %2040 = vmatmul.msk.bf16.gmra.mxu2 %vm527_vm0, %v2741_v27 }
  0x71   : > { %2424 = vrot.lane.b32.xlu0 %v2423_v30, %s2530_s27  ;;  %2429 = vrot.lane.b32.xlu1 %v2393_v17, %s2531_s28 }
  0x74   : > { %2434 = vrot.lane.b32.xlu2 %v2433_v32, %s2531_s28 }
  0x7e   : > { %v2750_v33 = vpop.permute.xlu2 %2294 }
  0x7f   : > { %v2296_v2 = vunpack.i.l.bf16 %v2750_v33  ;;  %v2297_v6 = vunpack.i.h.bf16 %v2750_v33 }
  0x80   : > { %2041 = vmatmul.msk.bf16.gmra.mxu2 %vm527_vm0, %v2643_v7 }
  0x86   : > { %v2300_v36 = vpop.permute.xlu2 %2299 }
  0x87   : > { %v2301_v3 = vunpack.i.l.bf16 %v2300_v36  ;;  %v2302_v4 = vunpack.i.h.bf16 %v2300_v36 }
  0x8e   : > { %v2765_v45 = vpop.permute.xlu2 %2314 }
  0x8f   : > { %v2316_v17 = vunpack.i.l.bf16 %v2765_v45  ;;  %v2317_v18 = vunpack.i.h.bf16 %v2765_v45 }
  0x90   : > { %2042 = vmatmul.msk.bf16.gmra.mxu2 %vm527_vm0, %v2646_v8 }
  0x93   : > { %v2275_v47 = vpop.permute.xlu0 %2274  ;;  %v2285_v48 = vpop.permute.xlu1 %2284 }
  0x94   : > { %v2277_v51 = vunpack.i.h.bf16 %v2275_v47  ;;  %v2276_v52 = vunpack.i.l.bf16 %v2275_v47  ;;  %v2286_v53 = vunpack.i.l.bf16 %v2285_v48  ;;  %v2287_v54 = vunpack.i.h.bf16 %v2285_v48 }
  0x96   : > { %559 = vst.msk [vmem:[#allocation3] sm:$0xff] %vm558_vm2, %v2276_v52  ;;  %v2330_v38 = vpop.permute.xlu2 %2329 }
  0x97   : > { %560 = vst.msk [vmem:[#allocation3 + $0x8] sm:$0xff] %vm558_vm2, %v2277_v51  ;;  %v2332_v55 = vunpack.i.h.bf16 %v2330_v38  ;;  %v2331_v56 = vunpack.i.l.bf16 %v2330_v38 }
  0x98   : > { %617 = vst.msk [vmem:[#allocation3 + $0x7] sm:$0xfe] %vm613_vm3, %v2286_v53 }
  0x99   : > { %618 = vst.msk [vmem:[#allocation3 + $0xf] sm:$0x1] %vm615_vm4, %v2287_v54 }
  0x9a   : > { %561 = vst.msk [vmem:[#allocation3 + $0x10] sm:$0xff] %vm558_vm2, %v2331_v56 }
  0x9b   : > { %v2290_v58 = vpop.permute.xlu1 %2289  ;;  %v2280_v60 = vpop.permute.xlu0 %2279  ;;  %562 = vst.msk [vmem:[#allocation3 + $0x18] sm:$0xff] %vm558_vm2, %v2332_v55 }
  0x9c   : > { %v2292_v61 = vunpack.i.h.bf16 %v2290_v58  ;;  %v2282_v62 = vunpack.i.h.bf16 %v2280_v60  ;;  %v2281_v63 = vunpack.i.l.bf16 %v2280_v60  ;;  %v2291_v1 = vunpack.i.l.bf16 %v2290_v58 }
  0x9e   : > { %653 = vst.msk [vmem:[#allocation3 + $0x8] sm:$0xff] %vm651_vm5, %v2292_v61  ;;  %v2345_v16 = vpop.permute.xlu2 %2344 }
  0x9f   : > { %614 = vst.msk [vmem:[#allocation3 - $0x1] sm:$0xfe] %vm613_vm3, %v2281_v63  ;;  %v2346_v33 = vunpack.i.l.bf16 %v2345_v16  ;;  %v2347_v35 = vunpack.i.h.bf16 %v2345_v16 }
  0xa0   : > { %616 = vst.msk [vmem:[#allocation3 + $0x7] sm:$0x1] %vm615_vm4, %v2282_v62  ;;  %2043 = vmatmul.msk.bf16.gmra.mxu2 %vm527_vm0, %v2692_v44 }
  0xa1   : > { %652 = vst.msk [vmem:[#allocation3] sm:$0xff] %vm651_vm5, %v2291_v1 }
  0xa2   : > { %683 = vst.msk [vmem:[#allocation3] sm:$0xff] %vm682_vm6, %v2296_v2 }
  0xa3   : > { %732 = vst.msk [vmem:[#allocation3 - $0x1] sm:$0xfe] %vm731_vm7, %v2301_v3  ;;  %v2310_v9 = vpop.permute.xlu1 %2309  ;;  %v2305_v10 = vpop.permute.xlu0 %2304 }
  0xa4   : > { %734 = vst.msk [vmem:[#allocation3 + $0x7] sm:$0x1] %vm733_vm8, %v2302_v4  ;;  %v2311_v11 = vunpack.i.l.bf16 %v2310_v9  ;;  %v2307_v14 = vunpack.i.h.bf16 %v2305_v10  ;;  %v2306_v15 = vunpack.i.l.bf16 %v2305_v10  ;;  %v2312_v59 = vunpack.i.h.bf16 %v2310_v9 }
  0xa5   : > { %684 = vst.msk [vmem:[#allocation3 + $0x8] sm:$0xff] %vm682_vm6, %v2297_v6 }
  0xa6   : > { %736 = vst.msk [vmem:[#allocation3 + $0xf] sm:$0x1] %vm733_vm8, %v2307_v14  ;;  %v2360_v25 = vpop.permute.xlu2 %2359 }
  0xa7   : > { %735 = vst.msk [vmem:[#allocation3 + $0x7] sm:$0xfe] %vm731_vm7, %v2306_v15  ;;  %v2361_v48 = vunpack.i.l.bf16 %v2360_v25  ;;  %v2362_v50 = vunpack.i.h.bf16 %v2360_v25 }
  0xa8   : > { %765 = vst.msk [vmem:[#allocation3] sm:$0xff] %vm764_vm9, %v2311_v11 }
  0xa9   : > { %766 = vst.msk [vmem:[#allocation3 + $0x8] sm:$0xff] %vm764_vm9, %v2312_v59 }
  0xaa   : > { %791 = vst.msk [vmem:[#allocation3] sm:$0xff] %vm790_vm10, %v2316_v17 }
  0xab   : > { %792 = vst.msk [vmem:[#allocation3 + $0x8] sm:$0xff] %vm790_vm10, %v2317_v18  ;;  %v2325_v19 = vpop.permute.xlu1 %2324  ;;  %v2320_v20 = vpop.permute.xlu0 %2319 }
  0xac   : > { %v2327_v21 = vunpack.i.h.bf16 %v2325_v19  ;;  %v2326_v22 = vunpack.i.l.bf16 %v2325_v19  ;;  %v2321_v23 = vunpack.i.l.bf16 %v2320_v20  ;;  %v2322_v24 = vunpack.i.h.bf16 %v2320_v20 }
  0xae   : > { %838 = vst.msk [vmem:[#allocation3 + $0x7] sm:$0xfe] %vm834_vm11, %v2326_v22  ;;  %v2375_v0 = vpop.permute.xlu2 %2374 }
  0xaf   : > { %839 = vst.msk [vmem:[#allocation3 + $0xf] sm:$0x1] %vm836_vm12, %v2327_v21  ;;  %v2376_v57 = vunpack.i.l.bf16 %v2375_v0  ;;  %v2377_v58 = vunpack.i.h.bf16 %v2375_v0 }
  0xb0   : > { %835 = vst.msk [vmem:[#allocation3 - $0x1] sm:$0xfe] %vm834_vm11, %v2321_v23  ;;  %2044 = vmatmul.msk.bf16.gmra.mxu2 %vm527_vm0, %v2689_v43  ;;  %v2872_v43 = vld [vmem:[%s3314_s2] ss:$0 sm:$0xff] }
  0xb1   : > { %837 = vst.msk [vmem:[#allocation3 + $0x7] sm:$0x1] %vm836_vm12, %v2322_v24 }
  0xb3   : > { %v2340_v26 = vpop.permute.xlu1 %2339  ;;  %v2335_v28 = vpop.permute.xlu0 %2334 }
  0xb4   : > { %v2342_v29 = vunpack.i.h.bf16 %v2340_v26  ;;  %v2341_v30 = vunpack.i.l.bf16 %v2340_v26  ;;  %v2337_v31 = vunpack.i.h.bf16 %v2335_v28  ;;  %v2336_v32 = vunpack.i.l.bf16 %v2335_v28 }
  0xb6   : > { %622 = vst.msk [vmem:[#allocation3 + $0x1f] sm:$0x1] %vm615_vm4, %v2342_v29  ;;  %v849_v34 = vld [vmem:[#allocation3 + $0x8] sm:$0xff]  ;;  %v2390_v51 = vpop.permute.xlu2 %2389 }
  0xb7   : > { %621 = vst.msk [vmem:[#allocation3 + $0x17] sm:$0xfe] %vm613_vm3, %v2341_v30  ;;  %v2391_v3 = vunpack.i.l.bf16 %v2390_v51  ;;  %v2392_v4 = vunpack.i.h.bf16 %v2390_v51  ;;  %v2070_v51 = vld [vmem:[%s3317_s5 + $0x38] sm:$0xff] }
  0xb8   : > { %620 = vst.msk [vmem:[#allocation3 + $0x17] sm:$0x1] %vm615_vm4, %v2337_v31  ;;  %v848_v36 = vld [vmem:[#allocation3] sm:$0xff]  ;;  %1385 = vmatpush.bf16.msrb.mxu0 %v2070_v51  ;;  %2200 = vmatpush.bf16.msra.mxu1 %v2070_v51 }
  0xb9   : > { %619 = vst.msk [vmem:[#allocation3 + $0xf] sm:$0xfe] %vm613_vm3, %v2336_v32  ;;  %v854_v37 = vpack.c.bf16 %v849_v34, %v848_v36 }
  0xba   : > { %654 = vst.msk [vmem:[#allocation3 + $0x10] sm:$0xff] %vm651_vm5, %v2346_v33 }
  0xbb   : > { %655 = vst.msk [vmem:[#allocation3 + $0x18] sm:$0xff] %vm651_vm5, %v2347_v35  ;;  %1984 = vmatmul.msk.bf16.vlgmr.msra.gmra.mxu0 %vm897_vm13, %v854_v37  ;;  %v2355_v39 = vpop.permute.xlu1 %2354  ;;  %v2350_v40 = vpop.permute.xlu0 %2349 }
  0xbc   : > { %v2356_v41 = vunpack.i.l.bf16 %v2355_v39  ;;  %v2352_v45 = vunpack.i.h.bf16 %v2350_v40  ;;  %v2351_v46 = vunpack.i.l.bf16 %v2350_v40  ;;  %v2357_v47 = vunpack.i.h.bf16 %v2355_v39 }
  0xbe   : > { %686 = vst.msk [vmem:[#allocation3 + $0x18] sm:$0xff] %vm682_vm6, %v2352_v45  ;;  %v2405_v2 = vpop.permute.xlu2 %2404  ;;  %v2532_v45 = vmov 0.0  }
  0xbf   : > { %685 = vst.msk [vmem:[#allocation3 + $0x10] sm:$0xff] %vm682_vm6, %v2351_v46  ;;  %v2406_v16 = vunpack.i.l.bf16 %v2405_v2  ;;  %v2407_v59 = vunpack.i.h.bf16 %v2405_v2  ;;  %v969_v46 = vstv %s968_s11  ;;  %v2066_v2 = vld [vmem:[%s3317_s5 + $0x18] sm:$0xff]  ;;  %s3214_s11 = sld [smem:[#allocation4 + $0x3]] }
  0xc0   : > { %737 = vst.msk [vmem:[#allocation3 + $0xf] sm:$0xfe] %vm731_vm7, %v2356_v41  ;;  %2045 = vmatmul.msk.bf16.gmra.mxu2 %vm527_vm0, %v2726_v5  ;;  %v2874_v5 = vstv %s411_s30  ;;  %vm970_vm15 = vcmp.eq.s32.totalorder %v969_v46, 1 }
  0xc1   : > { %738 = vst.msk [vmem:[#allocation3 + $0x17] sm:$0x1] %vm733_vm8, %v2357_v47 }
  0xc2   : > { %739 = vst.msk [vmem:[#allocation3 + $0x17] sm:$0xfe] %vm731_vm7, %v2361_v48 }
  0xc3   : > { %740 = vst.msk [vmem:[#allocation3 + $0x1f] sm:$0x1] %vm733_vm8, %v2362_v50  ;;  %v2370_v52 = vpop.permute.xlu1 %2369  ;;  %v2365_v53 = vpop.permute.xlu0 %2364 }
  0xc4   : > { %v2371_v54 = vunpack.i.l.bf16 %v2370_v52  ;;  %v2367_v38 = vunpack.i.h.bf16 %v2365_v53  ;;  %v2366_v55 = vunpack.i.l.bf16 %v2365_v53  ;;  %v2372_v56 = vunpack.i.h.bf16 %v2370_v52  ;;  %v1626_v40 = vpop.f32.mrf.mxu3  ;;  %1017 = vst [vmem:[#allocation2] sm:$0x1] %v2532_v45  ;;  %v2057_v53 = vld [vmem:[%s2637_s12 + $0xa0] sm:$0xff] }
  0xc5   : > { %1018 = vst [vmem:[#allocation2 + $0x10] sm:$0x1] %v2532_v45  ;;  %2047 = vmatmul.msk.bf16.gmra.mxu3 %vm527_vm0, %v2057_v53 }
  0xc6   : > { %767 = vst.msk [vmem:[#allocation3 + $0x10] sm:$0xff] %vm764_vm9, %v2366_v55  ;;  %v2420_v17 = vpop.permute.xlu2 %2419  ;;  %v2069_v55 = vld [vmem:[%s3317_s5 + $0x30] sm:$0xff] }
  0xc7   : > { %768 = vst.msk [vmem:[#allocation3 + $0x18] sm:$0xff] %vm764_vm9, %v2367_v38  ;;  %v2421_v26 = vunpack.i.l.bf16 %v2420_v17  ;;  %v2422_v28 = vunpack.i.h.bf16 %v2420_v17  ;;  %1386 = vmatpush.bf16.msrb.mxu0 %v2069_v55  ;;  %2201 = vmatpush.bf16.msra.mxu1 %v2069_v55 }
  0xc8   : > { %793 = vst.msk [vmem:[#allocation3 + $0x10] sm:$0xff] %vm790_vm10, %v2371_v54 }
  0xc9   : > { %794 = vst.msk [vmem:[#allocation3 + $0x18] sm:$0xff] %vm790_vm10, %v2372_v56 }
  0xca   : > { %840 = vst.msk [vmem:[#allocation3 + $0xf] sm:$0xfe] %vm834_vm11, %v2376_v57 }
  0xcb   : > { %841 = vst.msk [vmem:[#allocation3 + $0x17] sm:$0x1] %vm836_vm12, %v2377_v58  ;;  %v2385_v27 = vpop.permute.xlu1 %2384  ;;  %v2380_v60 = vpop.permute.xlu0 %2379  ;;  %v2068_v58 = vld [vmem:[%s3317_s5 + $0x28] sm:$0xff] }
  0xcc   : > { %v2387_v61 = vunpack.i.h.bf16 %v2385_v27  ;;  %v2386_v62 = vunpack.i.l.bf16 %v2385_v27  ;;  %v2381_v63 = vunpack.i.l.bf16 %v2380_v60  ;;  %v2382_v1 = vunpack.i.h.bf16 %v2380_v60  ;;  %v1627_v41 = vpop.f32.mrf.mxu3  ;;  %1019 = vst [vmem:[#allocation2 + $0x20] sm:$0x1] %v2532_v45  ;;  %v2894_v27 = vld [vmem:[%s3315_s3 + $0x1] ss:$0 sm:$0xff]  ;;  %1387 = vmatpush.bf16.msrb.mxu0 %v2068_v58  ;;  %2202 = vmatpush.bf16.msra.mxu1 %v2068_v58  ;;  %v2973_v58 = vld [vmem:[%s3315_s3 + $0x7] ss:$0 sm:$0xff] }
  0xcd   : > { %1020 = vst [vmem:[#allocation2 + $0x30] sm:$0x1] %v2532_v45  ;;  %v2067_v60 = vld [vmem:[%s3317_s5 + $0x20] sm:$0xff] }
  0xce   : > { %564 = vst.msk [vmem:[#allocation3 + $0x28] sm:$0xff] %vm558_vm2, %v2387_v61  ;;  %v2435_v29 = vpop.permute.xlu2 %2434 }
  0xcf   : > { %563 = vst.msk [vmem:[#allocation3 + $0x20] sm:$0xff] %vm558_vm2, %v2386_v62  ;;  %v2436_v34 = vunpack.i.l.bf16 %v2435_v29  ;;  %v2437_v35 = vunpack.i.h.bf16 %v2435_v29  ;;  %vm1075_vm2 = vcmask 1046528  }
  0xd0   : > { %842 = vst.msk [vmem:[#allocation3 + $0x17] sm:$0xfe] %vm834_vm11, %v2381_v63  ;;  %1388 = vmatpush.bf16.msrb.mxu0 %v2067_v60  ;;  %2203 = vmatpush.bf16.msra.mxu1 %v2067_v60 }
  0xd1   : > { %843 = vst.msk [vmem:[#allocation3 + $0x1f] sm:$0x1] %vm836_vm12, %v2382_v1 }
  0xd2   : > { %623 = vst.msk [vmem:[#allocation3 + $0x1f] sm:$0xfe] %vm613_vm3, %v2391_v3  ;;  %v850_v7 = vld [vmem:[#allocation3 + $0x10] sm:$0xff]  ;;  %v2907_v3 = vld [vmem:[%s3315_s3 + $0x2] ss:$0 sm:$0xff] }
  0xd3   : > { %624 = vst.msk [vmem:[#allocation3 + $0x27] sm:$0x1] %vm615_vm4, %v2392_v4  ;;  %v2400_v6 = vpop.permute.xlu1 %2399  ;;  %v2395_v9 = vpop.permute.xlu0 %2394 }
  0xd4   : > { %v2401_v10 = vunpack.i.l.bf16 %v2400_v6  ;;  %v2397_v11 = vunpack.i.h.bf16 %v2395_v9  ;;  %v2396_v14 = vunpack.i.l.bf16 %v2395_v9  ;;  %v2402_v15 = vunpack.i.h.bf16 %v2400_v6  ;;  %1023 = vst [vmem:[#allocation2 + $0x9] sm:$0x1] %v2532_v45  ;;  %1389 = vmatpush.bf16.msrb.mxu0 %v2066_v2  ;;  %v2065_v9 = vld [vmem:[%s3317_s5 + $0x10] sm:$0xff]  ;;  %2204 = vmatpush.bf16.msra.mxu1 %v2066_v2 }
  0xd5   : > { %1024 = vst [vmem:[#allocation2 + $0x19] sm:$0x1] %v2532_v45  ;;  %2048 = vmatmul.msk.bf16.gmra.mxu3 %vm527_vm0, %v2651_v12  ;;  %v2064_v12 = vld [vmem:[%s3317_s5 + $0x8] sm:$0xff] }
  0xd6   : > { %656 = vst.msk [vmem:[#allocation3 + $0x20] sm:$0xff] %vm651_vm5, %v2401_v10  ;;  %v2915_v10 = vld [vmem:[%s3315_s3] ss:$0 sm:$0xff] }
  0xd7   : > { %626 = vst.msk [vmem:[#allocation3 + $0x2f] sm:$0x1] %vm615_vm4, %v2397_v11 }
  0xd8   : > { %625 = vst.msk [vmem:[#allocation3 + $0x27] sm:$0xfe] %vm613_vm3, %v2396_v14  ;;  %v851_v18 = vld [vmem:[#allocation3 + $0x18] sm:$0xff]  ;;  %1390 = vmatpush.bf16.msrb.mxu0 %v2065_v9  ;;  %2205 = vmatpush.bf16.msra.mxu1 %v2065_v9  ;;  %vm1114_vm3 = vcmask 1045504  }
  0xd9   : > { %657 = vst.msk [vmem:[#allocation3 + $0x28] sm:$0xff] %vm651_vm5, %v2402_v15  ;;  %v855_v19 = vpack.c.bf16 %v851_v18, %v850_v7 }
  0xda   : > { %687 = vst.msk [vmem:[#allocation3 + $0x20] sm:$0xff] %vm682_vm6, %v2406_v16  ;;  %v2925_v16 = vld [vmem:[%s3315_s3 + $0x4] ss:$0 sm:$0xff] }
  0xdb   : > { %688 = vst.msk [vmem:[#allocation3 + $0x28] sm:$0xff] %vm682_vm6, %v2407_v59  ;;  %1985 = vmatmul.msk.bf16.gmra.mxu0 %vm897_vm13, %v855_v19  ;;  %v2415_v20 = vpop.permute.xlu1 %2414  ;;  %v2410_v21 = vpop.permute.xlu0 %2409 }
  0xdc   : > { %v2417_v22 = vunpack.i.h.bf16 %v2415_v20  ;;  %v2416_v23 = vunpack.i.l.bf16 %v2415_v20  ;;  %v2412_v24 = vunpack.i.h.bf16 %v2410_v21  ;;  %v2411_v25 = vunpack.i.l.bf16 %v2410_v21  ;;  %1025 = vst [vmem:[#allocation2 + $0x29] sm:$0x1] %v2532_v45  ;;  %v2934_v21 = vld [vmem:[%s3315_s3 + $0x3] ss:$0 sm:$0xff]  ;;  %1391 = vmatpush.bf16.msrb.mxu0 %v2064_v12  ;;  %2206 = vmatpush.bf16.msra.mxu1 %v2064_v12 }
  0xdd   : > { %1026 = vst [vmem:[#allocation2 + $0x39] sm:$0x1] %v2532_v45 }
  0xde   : > { %743 = vst.msk [vmem:[#allocation3 + $0x27] sm:$0xfe] %vm731_vm7, %v2416_v23 }
  0xdf   : > { %744 = vst.msk [vmem:[#allocation3 + $0x2f] sm:$0x1] %vm733_vm8, %v2417_v22 }
  0xe0   : > { %742 = vst.msk [vmem:[#allocation3 + $0x27] sm:$0x1] %vm733_vm8, %v2412_v24 }
  0xe1   : > { %741 = vst.msk [vmem:[#allocation3 + $0x1f] sm:$0xfe] %vm731_vm7, %v2411_v25 }
  0xe2   : > { %769 = vst.msk [vmem:[#allocation3 + $0x20] sm:$0xff] %vm764_vm9, %v2421_v26 }
  0xe3   : > { %770 = vst.msk [vmem:[#allocation3 + $0x28] sm:$0xff] %vm764_vm9, %v2422_v28  ;;  %v2425_v30 = vpop.permute.xlu0 %2424  ;;  %v2430_v31 = vpop.permute.xlu1 %2429  ;;  %v2063_v28 = vld [vmem:[%s3317_s5] sm:$0xff] }
  0xe4   : > { %v2427_v32 = vunpack.i.h.bf16 %v2425_v30  ;;  %v2426_v33 = vunpack.i.l.bf16 %v2425_v30  ;;  %v2431_v36 = vunpack.i.l.bf16 %v2430_v31  ;;  %v2432_v0 = vunpack.i.h.bf16 %v2430_v31  ;;  %1021 = vst [vmem:[#allocation2 + $0x40] sm:$0x1] %v2532_v45  ;;  %v2947_v30 = vld [vmem:[%s3315_s3 + $0x5] ss:$0 sm:$0xff]  ;;  %1392 = vmatpush.bf16.msrb.mxu0 %v2063_v28  ;;  %2207 = vmatpush.bf16.msra.mxu1 %v2063_v28 }
  0xe5   : > { %1022 = vst [vmem:[#allocation2 + $0x50] sm:$0x1] %v2532_v45  ;;  %2049 = vmatmul.msk.bf16.gmra.mxu3 %vm527_vm0, %v2654_v13 }
  0xe6   : > { %795 = vst.msk [vmem:[#allocation3 + $0x20] sm:$0xff] %vm790_vm10, %v2426_v33 }
  0xe7   : > { %796 = vst.msk [vmem:[#allocation3 + $0x28] sm:$0xff] %vm790_vm10, %v2427_v32 }
  0xe8   : > { %846 = vst.msk [vmem:[#allocation3 + $0x27] sm:$0xfe] %vm834_vm11, %v2436_v34  ;;  %1544 = vmatpush.bf16.msra.mxu0 %v2761_v42  ;;  %2208 = vmatpush.bf16.msrb.mxu1 %v2761_v42 }
  0xe9   : > { %847 = vst.msk [vmem:[#allocation3 + $0x2f] sm:$0x1] %vm836_vm12, %v2437_v35 }
  0xea   : > { %844 = vst.msk [vmem:[#allocation3 + $0x1f] sm:$0xfe] %vm834_vm11, %v2431_v36 }
  0xeb   : > { %845 = vst.msk [vmem:[#allocation3 + $0x27] sm:$0x1] %vm836_vm12, %v2432_v0 }
  0xec   : > { %1027 = vst [vmem:[#allocation2 + $0x49] sm:$0x1] %v2532_v45 }
  0xed   : > { %1028 = vst [vmem:[#allocation2 + $0x59] sm:$0x1] %v2532_v45 }
  0xf0   : > { %v853_v8 = vld [vmem:[#allocation3 + $0x28] sm:$0xff] }
  0xf2   : > { %v852_v37 = vld [vmem:[#allocation3 + $0x20] sm:$0xff] }
  0xf3   : > { %v856_v39 = vpack.c.bf16 %v853_v8, %v852_v37 }
  0xf5   : > { %1986 = vmatmul.msk.bf16.gmra.mxu0 %vm897_vm13, %v856_v39  ;;  %2050 = vmatmul.msk.bf16.gmra.mxu3 %vm527_vm0, %v2699_v49 }
 0x138   : > { %v920_v44 = vpop.f32.mrf.mxu0 }
 0x139   : > { %v921_v47 = vadd.f32 %v2872_v43, %v920_v44 }
 0x13b   : > { %vm935_vm14 = vcmp.ge.f32.partialorder %v921_v47, 0.0  ;;  %v942_v48 = vmul.f32 %v2874_v5, %v921_v47 }
 0x13d   : > { %v948_v50 = vsel %vm935_vm14, %v921_v47, %v942_v48 }
 0x13e   : > { %v1011_v52 = vsel %vm970_vm15, %v948_v50, 0.0 }
 0x13f   : > { %1029 = vst [vmem:[#allocation2 + $0x1] sm:$0xff] %v1011_v52 }
 0x140   : > { %v922_v54 = vpop.f32.mrf.mxu0 }
 0x141   : > { %v923_v38 = vadd.f32 %v2872_v43, %v922_v54 }
 0x143   : > { %vm936_vm1 = vcmp.ge.f32.partialorder %v923_v38, 0.0  ;;  %v943_v56 = vmul.f32 %v2874_v5, %v923_v38 }
 0x145   : > { %v949_v57 = vsel %vm936_vm1, %v923_v38, %v943_v56 }
 0x146   : > { %1030 = vst [vmem:[#allocation2 + $0x11] sm:$0xff] %v949_v57  ;;  %v1035_v61 = vld [vmem:[#allocation2] sm:$0xff]  ;;  %v1036_v62 = vld [vmem:[#allocation2 + $0x8] sm:$0x3] }
 0x147   : > { %v1059_v63 = vmul.f32 %v2894_v27, %v1035_v61  ;;  %v1060_v1 = vmul.f32 %v2894_v27, %v1036_v62  ;;  %v1098_v11 = vmul.f32 %v2907_v3, %v1035_v61  ;;  %v1099_v14 = vmul.f32 %v2907_v3, %v1036_v62  ;;  %v2968_v57 = vld [vmem:[%s3315_s3 + $0x6] ss:$0 sm:$0xff] }
 0x148   : > { %v1049_v7 = vmul.f32 %v2915_v10, %v1035_v61 }
 0x149   : > { %v1076_v4 = vrot.slane %v1059_v63, 1  ;;  %v1077_v6 = vrot.slane %v1060_v1, 1  ;;  %v1115_v18 = vrot.slane %v1098_v11, 2  ;;  %v1116_v19 = vrot.slane %v1099_v14, 2  ;;  %v2984_v14 = vld [vmem:[%s3315_s3 + $0x8] ss:$0 sm:$0xff] }
 0x14b   : > { %v1078_v15 = vsel %vm1075_vm2, %v1076_v4, %v1077_v6  ;;  %v1117_v29 = vsel %vm1114_vm3, %v1115_v18, %v1116_v19 }
 0x14c   : > { %v1092_v20 = vadd.f32 %v1078_v15, %v1049_v7 }
 0x14d   : > { %v1037_v59 = vld [vmem:[#allocation2 + $0x10] sm:$0xff]  ;;  %v1038_v17 = vld [vmem:[#allocation2 + $0x18] sm:$0x3] }
 0x14e   : > { %v1061_v22 = vmul.f32 %v2894_v27, %v1037_v59  ;;  %v1062_v23 = vmul.f32 %v2894_v27, %v1038_v17  ;;  %v1147_v24 = vmul.f32 %v2925_v16, %v1037_v59  ;;  %v1148_v25 = vmul.f32 %v2925_v16, %v1038_v17 }
 0x14f   : > { %v1131_v32 = vadd.f32 %v1117_v29, %v1092_v20  ;;  %v1137_v33 = vmul.f32 %v2934_v21, %v1037_v59  ;;  %v1100_v37 = vmul.f32 %v2907_v3, %v1037_v59  ;;  %v1101_v39 = vmul.f32 %v2907_v3, %v1038_v17 }
 0x150   : > { %v1079_v34 = vrot.slane %v1061_v22, 1  ;;  %v1080_v35 = vrot.slane %v1062_v23, 1  ;;  %v1163_v36 = vrot.slane %v1147_v24, 1  ;;  %v1164_v0 = vrot.slane %v1148_v25, 1 }
 0x151   : > { %v1185_v40 = vmul.f32 %v2947_v30, %v1037_v59  ;;  %v1186_v41 = vmul.f32 %v2947_v30, %v1038_v17  ;;  %v1141_v44 = vadd.f32 %v1137_v33, %v1131_v32  ;;  %v1050_v48 = vmul.f32 %v2915_v10, %v1037_v59 }
 0x152   : > { %v1081_v46 = vsel %vm1075_vm2, %v1079_v34, %v1080_v35  ;;  %v1165_v47 = vsel %vm1075_vm2, %v1163_v36, %v1164_v0  ;;  %v1118_v51 = vrot.slane %v1100_v37, 2  ;;  %v1119_v52 = vrot.slane %v1101_v39, 2 }
 0x153   : > { %v1201_v53 = vrot.slane %v1185_v40, 2  ;;  %v1202_v54 = vrot.slane %v1186_v41, 2  ;;  %v1093_v55 = vadd.f32 %v1081_v46, %v1050_v48  ;;  %v1179_v56 = vadd.f32 %v1165_v47, %v1141_v44 }
 0x154   : > { %v1120_v60 = vsel %vm1114_vm3, %v1118_v51, %v1119_v52 }
 0x155   : > { %v1203_v13 = vsel %vm1114_vm3, %v1201_v53, %v1202_v54  ;;  %v1132_v1 = vadd.f32 %v1120_v60, %v1093_v55 }
 0x156   : > { %v1217_v2 = vadd.f32 %v1203_v13, %v1179_v56 }
 0x158   : > { %v925_v26 = vpop.f32.mrf.mxu0 }
 0x159   : > { %v926_v31 = vadd.f32 %v2872_v43, %v925_v26 }
 0x15b   : > { %vm937_vm4 = vcmp.ge.f32.partialorder %v926_v31, 0.0  ;;  %v944_v8 = vmul.f32 %v2874_v5, %v926_v31 }
 0x15d   : > { %v950_v45 = vsel %vm937_vm4, %v926_v31, %v944_v8 }
 0x15e   : > { %1031 = vst [vmem:[#allocation2 + $0x21] sm:$0xff] %v950_v45 }
 0x160   : > { %v927_v50 = vpop.f32.mrf.mxu0 }
 0x161   : > { %v928_v38 = vadd.f32 %v2872_v43, %v927_v50 }
 0x163   : > { %vm938_vm5 = vcmp.ge.f32.partialorder %v928_v38, 0.0  ;;  %v945_v42 = vmul.f32 %v2874_v5, %v928_v38 }
 0x165   : > { %v951_v61 = vsel %vm938_vm5, %v928_v38, %v945_v42  ;;  %v1039_v62 = vld [vmem:[#allocation2 + $0x20] sm:$0xff]  ;;  %v1040_v63 = vld [vmem:[#allocation2 + $0x28] sm:$0x3] }
 0x166   : > { %1032 = vst [vmem:[#allocation2 + $0x31] sm:$0xff] %v951_v61  ;;  %v1138_v4 = vmul.f32 %v2934_v21, %v1039_v62  ;;  %v1149_v6 = vmul.f32 %v2925_v16, %v1039_v62  ;;  %v1150_v9 = vmul.f32 %v2925_v16, %v1040_v63  ;;  %v1187_v11 = vmul.f32 %v2947_v30, %v1039_v62 }
 0x167   : > { %v1188_v15 = vmul.f32 %v2947_v30, %v1040_v63  ;;  %v1223_v59 = vmul.f32 %v2968_v57, %v1039_v62  ;;  %v1233_v17 = vmul.f32 %v2973_v58, %v1039_v62  ;;  %v1234_v7 = vmul.f32 %v2973_v58, %v1040_v63 }
 0x168   : > { %v1142_v18 = vadd.f32 %v1138_v4, %v1132_v1  ;;  %v1166_v19 = vrot.slane %v1149_v6, 1  ;;  %v1167_v12 = vrot.slane %v1150_v9, 1  ;;  %v1204_v20 = vrot.slane %v1187_v11, 2 }
 0x169   : > { %v1205_v22 = vrot.slane %v1188_v15, 2  ;;  %v1227_v23 = vadd.f32 %v1223_v59, %v1217_v2  ;;  %v1249_v24 = vrot.slane %v1233_v17, 1  ;;  %v1250_v25 = vrot.slane %v1234_v7, 1  ;;  %v3017_v2 = vld [vmem:[%s3316_s4] ss:$0 sm:$0xff] }
 0x16a   : > { %v1168_v26 = vsel %vm1075_vm2, %v1166_v19, %v1167_v12  ;;  %v1271_v28 = vmul.f32 %v2984_v14, %v1039_v62  ;;  %v1272_v29 = vmul.f32 %v2984_v14, %v1040_v63  ;;  %v1063_v33 = vmul.f32 %v2894_v27, %v1039_v62 }
 0x16b   : > { %v1180_v31 = vadd.f32 %v1168_v26, %v1142_v18  ;;  %v1251_v32 = vsel %vm1075_vm2, %v1249_v24, %v1250_v25  ;;  %v1206_v34 = vsel %vm1114_vm3, %v1204_v20, %v1205_v22  ;;  %v1064_v40 = vmul.f32 %v2894_v27, %v1040_v63 }
 0x16c   : > { %v1265_v35 = vadd.f32 %v1251_v32, %v1227_v23  ;;  %v1287_v36 = vrot.slane %v1271_v28, 2  ;;  %v1288_v39 = vrot.slane %v1272_v29, 2  ;;  %v1082_v41 = vrot.slane %v1063_v33, 1 }
 0x16d   : > { %v1041_v0 = vld [vmem:[#allocation2 + $0x30] sm:$0xff]  ;;  %v1042_v8 = vld [vmem:[#allocation2 + $0x38] sm:$0x3]  ;;  %v1218_v37 = vadd.f32 %v1206_v34, %v1180_v31  ;;  %v1102_v51 = vmul.f32 %v2907_v3, %v1039_v62  ;;  %v1103_v52 = vmul.f32 %v2907_v3, %v1040_v63  ;;  %v1083_v13 = vrot.slane %v1064_v40, 1 }
 0x16e   : > { %v1224_v45 = vmul.f32 %v2968_v57, %v1041_v0  ;;  %v1235_v44 = vmul.f32 %v2973_v58, %v1041_v0  ;;  %v1236_v46 = vmul.f32 %v2973_v58, %v1042_v8  ;;  %v1273_v47 = vmul.f32 %v2984_v14, %v1041_v0 }
 0x16f   : > { %v1274_v48 = vmul.f32 %v2984_v14, %v1042_v8  ;;  %v1065_v50 = vmul.f32 %v2894_v27, %v1041_v0  ;;  %v1289_v56 = vsel %vm1114_vm3, %v1287_v36, %v1288_v39  ;;  %v1066_v60 = vmul.f32 %v2894_v27, %v1042_v8 }
 0x170   : > { %v1228_v53 = vadd.f32 %v1224_v45, %v1218_v37  ;;  %v1252_v54 = vrot.slane %v1235_v44, 1  ;;  %v1253_v38 = vrot.slane %v1236_v46, 1  ;;  %v1290_v55 = vrot.slane %v1273_v47, 2 }
 0x171   : > { %v1291_v42 = vrot.slane %v1274_v48, 2  ;;  %v1303_v63 = vadd.f32 %v1289_v56, %v1265_v35  ;;  %v1051_v49 = vmul.f32 %v2915_v10, %v1039_v62  ;;  %v1085_v4 = vrot.slane %v1065_v50, 1 }
 0x172   : > { %v930_v61 = vpop.f32.mrf.mxu0  ;;  %v1254_v1 = vsel %vm1075_vm2, %v1252_v54, %v1253_v38  ;;  %v1104_v11 = vmul.f32 %v2907_v3, %v1041_v0  ;;  %v1084_v15 = vsel %vm1075_vm2, %v1082_v41, %v1083_v13  ;;  %v1086_v59 = vrot.slane %v1066_v60, 1  ;;  %v2451_v60 = vld [vmem:[%s2637_s12 + $0xc0] sm:$0xff]  }
 0x173   : > { %v931_v6 = vadd.f32 %v2872_v43, %v930_v61  ;;  %v1266_v27 = vadd.f32 %v1254_v1, %v1228_v53  ;;  %v1292_v9 = vsel %vm1114_vm3, %v1290_v55, %v1291_v42  ;;  %v1121_v17 = vrot.slane %v1102_v51, 2  ;;  %2051 = vmatmul.msk.bf16.gmra.mxu3 %vm527_vm0, %v2451_v60 }
 0x174   : > { %v1122_v7 = vrot.slane %v1103_v52, 2  ;;  %v1094_v12 = vadd.f32 %v1084_v15, %v1051_v49  ;;  %v985_v20 = vstv %s3011_s23  ;;  %v1311_v62 = vadd.f32 %v3017_v2, %v1303_v63 }
 0x175   : > { %vm939_vm6 = vcmp.ge.f32.partialorder %v931_v6, 0.0  ;;  %v946_v18 = vmul.f32 %v2874_v5, %v931_v6  ;;  %v1304_v19 = vadd.f32 %v1292_v9, %v1266_v27  ;;  %v1105_v22 = vmul.f32 %v2907_v3, %v1042_v8 }
 0x176   : > { %v1123_v23 = vsel %vm1114_vm3, %v1121_v17, %v1122_v7  ;;  %v1087_v26 = vsel %vm1075_vm2, %v1085_v4, %v1086_v59  ;;  %v1052_v29 = vmul.f32 %v2915_v10, %v1041_v0  ;;  %v1139_v31 = vmul.f32 %v2934_v21, %v1041_v0 }
 0x177   : > { %v952_v24 = vsel %vm939_vm6, %v931_v6, %v946_v18  ;;  %v1312_v25 = vadd.f32 %v3017_v2, %v1304_v19  ;;  %v1133_v28 = vadd.f32 %v1123_v23, %v1094_v12  ;;  %v1151_v32 = vmul.f32 %v2925_v16, %v1041_v0  ;;  %v3055_v18 = vpop.f32.mrf.mxu2 }
 0x178   : > { %1033 = vst [vmem:[#allocation2 + $0x41] sm:$0xff] %v952_v24  ;;  %v1152_v33 = vmul.f32 %v2925_v16, %v1042_v8  ;;  %v1124_v35 = vrot.slane %v1104_v11, 2  ;;  %v1189_v3 = vmul.f32 %v2947_v30, %v1041_v0  ;;  %v1190_v36 = vmul.f32 %v2947_v30, %v1042_v8 }
 0x179   : > { %v1315_v34 = vpack.c.bf16 %v1312_v25, %v1311_v62  ;;  %v1095_v39 = vadd.f32 %v1087_v26, %v1052_v29  ;;  %v1125_v40 = vrot.slane %v1105_v22, 2  ;;  %v1169_v41 = vrot.slane %v1151_v32, 1 }
 0x17a   : > { %v932_v37 = vpop.f32.mrf.mxu0  ;;  %v1170_v45 = vrot.slane %v1152_v33, 1  ;;  %v1143_v10 = vadd.f32 %v1139_v31, %v1133_v28  ;;  %v1207_v46 = vrot.slane %v1189_v3, 2  ;;  %v1208_v47 = vrot.slane %v1190_v36, 2  ;;  %v2452_v33 = vld [vmem:[%s2637_s12] sm:$0xff]  }
 0x17b   : > { %v933_v44 = vadd.f32 %v2872_v43, %v932_v37  ;;  %1393 = vmatmul.bf16.vlgmr.msrb.gmra.mxu0 %v1315_v34  ;;  %vm986_vm8 = vcmp.eq.s32.totalorder %v985_v20, 1  ;;  %v1126_v0 = vsel %vm1114_vm3, %v1124_v35, %v1125_v40 }
 0x17c   : > { %v1171_v48 = vsel %vm1075_vm2, %v1169_v41, %v1170_v45  ;;  %v1134_v53 = vadd.f32 %v1126_v0, %v1095_v39  ;;  %v1209_v43 = vsel %vm1114_vm3, %v1207_v46, %v1208_v47 }
 0x17d   : > { %vm940_vm7 = vcmp.ge.f32.partialorder %v933_v44, 0.0  ;;  %v947_v50 = vmul.f32 %v2874_v5, %v933_v44  ;;  %v1181_v54 = vadd.f32 %v1171_v48, %v1143_v10 }
 0x17f   : > { %v953_v8 = vsel %vm940_vm7, %v933_v44, %v947_v50  ;;  %v1043_v51 = vld [vmem:[#allocation2 + $0x40] sm:$0xff]  ;;  %v1044_v52 = vld [vmem:[#allocation2 + $0x48] sm:$0x3]  ;;  %v1590_v41 = vpop.f32.mrf.mxu2 }
 0x180   : > { %v1016_v38 = vsel %vm986_vm8, %v953_v8, 0.0  ;;  %v1140_v55 = vmul.f32 %v2934_v21, %v1043_v51  ;;  %v1153_v56 = vmul.f32 %v2925_v16, %v1043_v51  ;;  %v1154_v42 = vmul.f32 %v2925_v16, %v1044_v52  ;;  %v2453_v44 = vld [vmem:[%s2637_s12 + $0xc8] sm:$0xff]   ;;  %v2455_v8 = vld [vmem:[%s2637_s12 + $0xd0] sm:$0xff]  }
 0x181   : > { %1034 = vst [vmem:[#allocation2 + $0x51] sm:$0xff] %v1016_v38  ;;  %v1191_v5 = vmul.f32 %v2947_v30, %v1043_v51  ;;  %v1192_v13 = vmul.f32 %v2947_v30, %v1044_v52  ;;  %v1225_v61 = vmul.f32 %v2968_v57, %v1043_v51  ;;  %v1237_v1 = vmul.f32 %v2973_v58, %v1043_v51  ;;  %v2454_v50 = vld [vmem:[%s2637_s12 + $0x8] sm:$0xff]   ;;  %v2459_v38 = vld [vmem:[%s2637_s12 + $0x18] sm:$0xff]  }
 0x182   : > { %v1144_v63 = vadd.f32 %v1140_v55, %v1134_v53  ;;  %v1172_v49 = vrot.slane %v1153_v56, 1  ;;  %v1173_v4 = vrot.slane %v1154_v42, 1  ;;  %v1238_v21 = vmul.f32 %v2973_v58, %v1044_v52  ;;  %v2457_v53 = vld [vmem:[%s2637_s12 + $0x10] sm:$0xff]   ;;  %v1629_v56 = vpop.f32.mrf.mxu3 }
 0x183   : > { %v1210_v6 = vrot.slane %v1191_v5, 2  ;;  %v1211_v27 = vrot.slane %v1192_v13, 2  ;;  %v1219_v16 = vadd.f32 %v1209_v43, %v1181_v54  ;;  %v1255_v9 = vrot.slane %v1237_v1, 1  ;;  %2052 = vmatmul.msk.bf16.gmra.mxu3 %vm527_vm0, %v2453_v44  ;;  %v2458_v54 = vld [vmem:[%s2637_s12 + $0x28] sm:$0xff]   ;;  %v2460_v42 = vld [vmem:[%s2637_s12 + $0x30] sm:$0xff]   ;;  %v2461_v1 = vld [vmem:[%s2637_s12 + $0x38] sm:$0xff]  }
 0x184   : > { %v1174_v11 = vsel %vm1075_vm2, %v1172_v49, %v1173_v4  ;;  %v1256_v15 = vrot.slane %v1238_v21, 1  ;;  %v1275_v59 = vmul.f32 %v2984_v14, %v1043_v51  ;;  %v1276_v30 = vmul.f32 %v2984_v14, %v1044_v52  ;;  %v2456_v51 = vld [vmem:[%s2637_s12 + $0x20] sm:$0xff]   ;;  %v2058_v21 = vld [vmem:[%s2637_s12 + $0xd8] sm:$0xff] }
 0x185   : > { %v1182_v17 = vadd.f32 %v1174_v11, %v1144_v63  ;;  %v1229_v7 = vadd.f32 %v1225_v61, %v1219_v16  ;;  %v1212_v19 = vsel %vm1114_vm3, %v1210_v6, %v1211_v27  ;;  %v3096_v49 = vld [vmem:[%s3320_s8] ss:$0 sm:$0xff]  ;;  %v3101_v27 = vstv %s1965_s13 }
 0x186   : > { %v1257_v12 = vsel %vm1075_vm2, %v1255_v9, %v1256_v15  ;;  %v1293_v23 = vrot.slane %v1275_v59, 2  ;;  %v1294_v24 = vrot.slane %v1276_v30, 2  ;;  %v2462_v15 = vld [vmem:[%s2637_s12 + $0x40] sm:$0xff]  }
 0x187   : > { %v1220_v22 = vadd.f32 %v1212_v19, %v1182_v17  ;;  %v1267_v31 = vadd.f32 %v1257_v12, %v1229_v7  ;;  %v3073_v48 = vpop.f32.mrf.mxu2 }
 0x188   : > { %v1045_v20 = vld [vmem:[#allocation2 + $0x50] sm:$0xff]  ;;  %v1046_v62 = vld [vmem:[#allocation2 + $0x58] sm:$0x3]  ;;  %v1295_v39 = vsel %vm1114_vm3, %v1293_v23, %v1294_v24  ;;  %v1593_v56 = vadd.f32 %v3096_v49, %v3073_v48 }
 0x189   : > { %v1226_v25 = vmul.f32 %v2968_v57, %v1045_v20  ;;  %v1239_v26 = vmul.f32 %v2973_v58, %v1045_v20  ;;  %v1240_v28 = vmul.f32 %v2973_v58, %v1046_v62  ;;  %v1277_v29 = vmul.f32 %v2984_v14, %v1045_v20 }
 0x18a   : > { %v1278_v32 = vmul.f32 %v2984_v14, %v1046_v62  ;;  %v1305_v40 = vadd.f32 %v1295_v39, %v1267_v31  ;;  %v1630_v5 = vpop.f32.mrf.mxu3  ;;  %vm1670_vm14 = vcmp.ge.f32.partialorder %v1593_v56, 0.0 }
 0x18b   : > { %2027 = vmatmul.msk.bf16.vlgmr.msra.gmra.mxu0 %vm527_vm0, %v2452_v33  ;;  %v1230_v34 = vadd.f32 %v1226_v25, %v1220_v22  ;;  %v1258_v35 = vrot.slane %v1239_v26, 1  ;;  %v1259_v3 = vrot.slane %v1240_v28, 1  ;;  %v1296_v36 = vrot.slane %v1277_v29, 2  ;;  %v2463_v28 = vld [vmem:[%s2637_s12 + $0x48] sm:$0xff]  }
 0x18c   : > { %v1297_v37 = vrot.slane %v1278_v32, 2  ;;  %v1313_v10 = vadd.f32 %v3017_v2, %v1305_v40  ;;  %v3138_v40 = vstv %s1966_s29 }
 0x18d   : > { %v1260_v57 = vsel %vm1075_vm2, %v1258_v35, %v1259_v3 }
 0x18e   : > { %v1268_v58 = vadd.f32 %v1260_v57, %v1230_v34  ;;  %v1298_v14 = vsel %vm1114_vm3, %v1296_v36, %v1297_v37  ;;  %v3135_v57 = vld [vmem:[%s3318_s6] ss:$0 sm:$0xff] }
 0x18f   : > { %v1594_v0 = vpop.f32.mrf.mxu2 }
 0x190   : > { %v1306_v45 = vadd.f32 %v1298_v14, %v1268_v58 }
 0x192   : > { %v1314_v46 = vadd.f32 %v3017_v2, %v1306_v45  ;;  %v1632_v61 = vpop.f32.mrf.mxu3 }
 0x193   : > { %2053 = vmatmul.msk.bf16.gmra.mxu3 %vm527_vm0, %v2455_v8 }
 0x194   : > { %v1316_v47 = vpack.c.bf16 %v1314_v46, %v1313_v10 }
 0x196   : > { %1398 = vmatmul.bf16.vlgmr.msra.gmra.mxu1 %v1316_v47 }
 0x197   : > { %v3081_v52 = vpop.f32.mrf.mxu2 }
 0x19a   : > { %v1633_v63 = vpop.f32.mrf.mxu3 }
 0x19b   : > { %2028 = vmatmul.msk.bf16.gmra.mxu0 %vm527_vm0, %v2454_v50 }
 0x19f   : > { %v1598_v2 = vpop.f32.mrf.mxu2 }
 0x1a2   : > { %v3104_v11 = vpop.f32.mrf.mxu3 }
 0x1a3   : > { %2054 = vmatmul.msk.bf16.gmra.mxu3 %vm527_vm0, %v2058_v21 }
 0x1a6   : > { %2031 = vmatmul.msk.bf16.vlgmr.msrb.gmra.mxu1 %vm527_vm0, %v2456_v51 }
 0x1a7   : > { %v1600_v43 = vpop.f32.mrf.mxu2 }
 0x1aa   : > { %v1637_v22 = vpop.f32.mrf.mxu3 }
 0x1ab   : > { %2029 = vmatmul.msk.bf16.gmra.mxu0 %vm527_vm0, %v2457_v53 }
 0x1af   : > { %v1601_v55 = vpop.f32.mrf.mxu2 }
 0x1b2   : > { %v3118_v26 = vpop.f32.mrf.mxu3 }
 0x1b6   : > { %2032 = vmatmul.msk.bf16.gmra.mxu1 %vm527_vm0, %v2458_v54 }
 0x1b7   : > { %v1603_v60 = vpop.f32.mrf.mxu2 }
 0x1ba   : > { %v1641_v37 = vpop.f32.mrf.mxu3 }
 0x1bb   : > { %2030 = vmatmul.msk.bf16.gmra.mxu0 %vm527_vm0, %v2459_v38 }
 0x1bf   : > { %v1604_v13 = vpop.f32.mrf.mxu2 }
 0x1c6   : > { %2033 = vmatmul.msk.bf16.gmra.mxu1 %vm527_vm0, %v2460_v42 }
 0x1c7   : > { %v1606_v4 = vpop.f32.mrf.mxu2 }
 0x1c8   : > { %v1607_v6 = vadd.f32 %v3096_v49, %v1606_v4 }
 0x1ca   : > { %v1700_v16 = vmul.f32 %v3101_v27, %v1607_v6  ;;  %vm1672_vm9 = vcmp.ge.f32.partialorder %v1607_v6, 0.0 }
 0x1cc   : > { %v3108_v59 = vsel %vm1672_vm9, %v1607_v6, %v1700_v16 }
 0x1cd   : > { %v1787_v7 = vrot.slane %v3108_v59, 1 }
 0x1cf   : > { %v1608_v9 = vpop.f32.mrf.mxu2 }
 0x1d0   : > { %v1609_v30 = vadd.f32 %v3096_v49, %v1608_v9 }
 0x1d2   : > { %vm1673_vm10 = vcmp.ge.f32.partialorder %v1609_v30, 0.0  ;;  %v1701_v17 = vmul.f32 %v3101_v27, %v1609_v30 }
 0x1d4   : > { %v1728_v19 = vsel %vm1673_vm10, %v1609_v30, %v1701_v17 }
 0x1d5   : > { %v1788_v12 = vrot.slane %v1728_v19, 1 }
 0x1d6   : > { %2034 = vmatmul.msk.bf16.gmra.mxu1 %vm527_vm0, %v2461_v1  ;;  %v1698_v1 = vmul.f32 %v3101_v27, %v1593_v56 }
 0x1d7   : > { %v3114_v20 = vsel %vm1075_vm2, %v1787_v7, %v1788_v12  ;;  %v1611_v62 = vpop.f32.mrf.mxu2 }
 0x1d8   : > { %v1612_v23 = vadd.f32 %v3096_v49, %v1611_v62  ;;  %v3172_v19 = vsel %vm1670_vm14, %v1593_v56, %v1698_v1 }
 0x1da   : > { %v1702_v24 = vmul.f32 %v3101_v27, %v1612_v23  ;;  %vm1674_vm11 = vcmp.ge.f32.partialorder %v1612_v23, 0.0 }
 0x1dc   : > { %v3122_v29 = vsel %vm1674_vm11, %v1612_v23, %v1702_v24 }
 0x1dd   : > { %v1790_v34 = vrot.slane %v3122_v29, 1 }
 0x1df   : > { %v1613_v25 = vpop.f32.mrf.mxu2 }
 0x1e0   : > { %v1614_v31 = vadd.f32 %v3096_v49, %v1613_v25 }
 0x1e2   : > { %vm1675_vm12 = vcmp.ge.f32.partialorder %v1614_v31, 0.0  ;;  %v1703_v33 = vmul.f32 %v3101_v27, %v1614_v31 }
 0x1e4   : > { %v1730_v35 = vsel %vm1675_vm12, %v1614_v31, %v1703_v33 }
 0x1e5   : > { %v1791_v3 = vrot.slane %v1730_v35, 1 }
 0x1e6   : > { %2035 = vmatmul.msk.bf16.gmra.mxu1 %vm527_vm0, %v2462_v15 }
 0x1e7   : > { %v3130_v36 = vsel %vm1075_vm2, %v1790_v34, %v1791_v3  ;;  %v3145_v44 = vpop.f32.mrf.mxu2 }
 0x1ef   : > { %v3147_v50 = vpop.f32.mrf.mxu2 }
 0x1f6   : > { %2036 = vmatmul.msk.bf16.gmra.mxu1 %vm527_vm0, %v2463_v28  ;;  %v3143_v45 = vpop.f32.mrf.mxu3 }
 0x1f7   : > { %v1621_v2 = vpop.f32.mrf.mxu2 }
 0x1f8   : > { %v3125_v32 = vpop.f32.mrf.mxu0  ;;  %v1622_v5 = vadd.f32 %v3096_v49, %v1621_v2  ;;  %v1617_v2 = vadd.f32 %v3096_v49, %v3145_v44 }
 0x1fa   : > { %vm1678_vm1 = vcmp.ge.f32.partialorder %v1622_v5, 0.0  ;;  %v1706_v4 = vmul.f32 %v3101_v27, %v1622_v5  ;;  %vm1676_vm11 = vcmp.ge.f32.partialorder %v1617_v2, 0.0  ;;  %v1704_v44 = vmul.f32 %v3101_v27, %v1617_v2 }
 0x1fc   : > { %v1733_v12 = vsel %vm1678_vm1, %v1622_v5, %v1706_v4 }
 0x1fd   : > { %v1796_v35 = vrot.slane %v1733_v12, 1 }
 0x1fe   : > { %v1645_v46 = vpop.f32.mrf.mxu3 }
 0x1ff   : > { %v1623_v55 = vpop.f32.mrf.mxu2 }
 0x200   : > { %v1396_v39 = vpop.f32.mrf.mxu0  ;;  %v1624_v61 = vadd.f32 %v3096_v49, %v1623_v55 }
 0x201   : > { %v1397_v58 = vadd.f32 %v3135_v57, %v1396_v39 }
 0x202   : > { %v1707_v15 = vmul.f32 %v3101_v27, %v1624_v61  ;;  %vm1679_vm3 = vcmp.ge.f32.partialorder %v1624_v61, 0.0 }
 0x203   : > { %vm1405_vm13 = vcmp.ge.f32.partialorder %v1397_v58, 0.0  ;;  %v1410_v41 = vmul.f32 %v3138_v40, %v1397_v58 }
 0x204   : > { %v1734_v28 = vsel %vm1679_vm3, %v1624_v61, %v1707_v15  ;;  %v1619_v61 = vadd.f32 %v3096_v49, %v3147_v50 }
 0x205   : > { %v3141_v14 = vsel %vm1405_vm13, %v1397_v58, %v1410_v41  ;;  %v1797_v37 = vrot.slane %v1734_v28, 1 }
 0x206   : > { %v1647_v8 = vpop.f32.mrf.mxu3  ;;  %vm1677_vm1 = vcmp.ge.f32.partialorder %v1619_v61, 0.0 }
 0x207   : > { %v1648_v48 = vadd.f32 %v3096_v49, %v1647_v8  ;;  %v1597_v8 = vadd.f32 %v3096_v49, %v3081_v52  ;;  %v1798_v56 = vsel %vm1075_vm2, %v1796_v35, %v1797_v37 }
 0x208   : > { %v1546_v10 = vpop.f32.mrf.mxu0 }
 0x209   : > { %v1711_v62 = vmul.f32 %v3101_v27, %v1648_v48  ;;  %vm1683_vm7 = vcmp.ge.f32.partialorder %v1648_v48, 0.0  ;;  %v1699_v52 = vmul.f32 %v3101_v27, %v1597_v8  ;;  %vm1671_vm10 = vcmp.ge.f32.partialorder %v1597_v8, 0.0 }
 0x20b   : > { %v1726_v15 = vsel %vm1671_vm10, %v1597_v8, %v1699_v52 }
 0x20e   : > { %v1649_v54 = vpop.f32.mrf.mxu3 }
 0x210   : > { %v1547_v47 = vpop.f32.mrf.mxu0 }
 0x211   : > { %v1589_v47 = vadd.f32 %v3096_v49, %v3055_v18 }
 0x213   : > { %v3149_v0 = vpop.f32.mrf.mxu1  ;;  %vm1669_vm9 = vcmp.ge.f32.partialorder %v1589_v47, 0.0  ;;  %v1697_v18 = vmul.f32 %v3101_v27, %v1589_v47 }
 0x215   : > { %v3210_v50 = vsel %vm1669_vm9, %v1589_v47, %v1697_v18 }
 0x216   : > { %v1651_v60 = vpop.f32.mrf.mxu3 }
 0x218   : > { %v1549_v51 = vpop.f32.mrf.mxu0 }
 0x219   : > { %v1550_v6 = vadd.f32 %v3096_v49, %v1549_v51  ;;  %v1738_v51 = vsel %vm1683_vm7, %v1648_v48, %v1711_v62 }
 0x21b   : > { %v3151_v53 = vpop.f32.mrf.mxu1  ;;  %v1685_v22 = vmul.f32 %v3101_v27, %v1550_v6  ;;  %vm1657_vm5 = vcmp.ge.f32.partialorder %v1550_v6, 0.0 }
 0x21d   : > { %v3183_v58 = vsel %vm1657_vm5, %v1550_v6, %v1685_v22 }
 0x21e   : > { %v1652_v7 = vpop.f32.mrf.mxu3 }
 0x220   : > { %v1551_v43 = vpop.f32.mrf.mxu0 }
 0x221   : > { %v1552_v16 = vadd.f32 %v3096_v49, %v1551_v43  ;;  %v1751_v43 = vrot.slane %v3183_v58, 1 }
 0x223   : > { %v1564_v38 = vpop.f32.mrf.mxu1  ;;  %v1686_v23 = vmul.f32 %v3101_v27, %v1552_v16  ;;  %vm1658_vm6 = vcmp.ge.f32.partialorder %v1552_v16, 0.0 }
 0x224   : > { %v1565_v42 = vadd.f32 %v3096_v49, %v1564_v38 }
 0x225   : > { %v1713_v41 = vsel %vm1658_vm6, %v1552_v16, %v1686_v23  ;;  %v1705_v23 = vmul.f32 %v3101_v27, %v1619_v61 }
 0x226   : > { %v1691_v63 = vmul.f32 %v3101_v27, %v1565_v42  ;;  %vm1663_vm15 = vcmp.ge.f32.partialorder %v1565_v42, 0.0  ;;  %v1752_v38 = vrot.slane %v1713_v41, 1 }
 0x227   : > { %v1732_v8 = vsel %vm1677_vm1, %v1619_v61, %v1705_v23 }
 0x228   : > { %v3157_v13 = vpop.f32.mrf.mxu0  ;;  %v3168_v30 = vsel %vm1663_vm15, %v1565_v42, %v1691_v63 }
 0x229   : > { %v1760_v31 = vrot.slane %v3168_v30, 1  ;;  %v1742_v34 = vmax.f32 %v3168_v30, %v3172_v19  ;;  %v1555_v48 = vadd.f32 %v3096_v49, %v3157_v13  ;;  %v1731_v13 = vsel %vm1676_vm11, %v1617_v2, %v1704_v44 }
 0x22a   : > { %v1793_v52 = vrot.slane %v1731_v13, 1  ;;  %v1794_v44 = vrot.slane %v1732_v8, 1 }
 0x22b   : > { %v1566_v21 = vpop.f32.mrf.mxu1  ;;  %vm1659_vm14 = vcmp.ge.f32.partialorder %v1555_v48, 0.0 }
 0x22c   : > { %v1567_v9 = vadd.f32 %v3096_v49, %v1566_v21  ;;  %v3203_v21 = vsel %vm1075_vm2, %v1751_v43, %v1752_v38  ;;  %v3237_v38 = vstv %s3214_s11 }
 0x22e   : > { %vm1664_vm4 = vcmp.ge.f32.partialorder %v1567_v9, 0.0  ;;  %v1692_v17 = vmul.f32 %v3101_v27, %v1567_v9 }
 0x230   : > { %v1719_v24 = vsel %vm1664_vm4, %v1567_v9, %v1692_v17  ;;  %v1556_v25 = vpop.f32.mrf.mxu0  ;;  %v1402_v17 = vadd.f32 %v3135_v57, %v3151_v53 }
 0x231   : > { %v1761_v33 = vrot.slane %v1719_v24, 1  ;;  %v1557_v6 = vadd.f32 %v3096_v49, %v1556_v25  ;;  %v1687_v24 = vmul.f32 %v3101_v27, %v1555_v48 }
 0x232   : > { %vm1407_vm3 = vcmp.ge.f32.partialorder %v1402_v17, 0.0 }
 0x233   : > { %v3181_v3 = vsel %vm1075_vm2, %v1760_v31, %v1761_v33  ;;  %v1569_v39 = vpop.f32.mrf.mxu1  ;;  %v1688_v25 = vmul.f32 %v3101_v27, %v1557_v6  ;;  %vm1660_vm15 = vcmp.ge.f32.partialorder %v1557_v6, 0.0  ;;  %v3231_v41 = vsel %vm1659_vm14, %v1555_v48, %v1687_v24 }
 0x234   : > { %v1770_v10 = vmax.f32 %v1742_v34, %v3181_v3  ;;  %v1570_v46 = vadd.f32 %v3096_v49, %v1569_v39 }
 0x236   : > { %v1774_v54 = vmax.f32 %v1770_v10, %v1733_v12  ;;  %v1693_v55 = vmul.f32 %v3101_v27, %v1570_v46  ;;  %vm1665_vm8 = vcmp.ge.f32.partialorder %v1570_v46, 0.0  ;;  %v1644_v12 = vadd.f32 %v3096_v49, %v3143_v45 }
 0x237   : > { %v1412_v45 = vmul.f32 %v3138_v40, %v1402_v17  ;;  %v1715_v10 = vsel %vm1660_vm15, %v1557_v6, %v1688_v25 }
 0x238   : > { %v1778_v42 = vmax.f32 %v1774_v54, %v1738_v51  ;;  %v1559_v60 = vpop.f32.mrf.mxu0  ;;  %v1720_v1 = vsel %vm1665_vm8, %v1570_v46, %v1693_v55  ;;  %vm1682_vm5 = vcmp.ge.f32.partialorder %v1644_v12, 0.0  ;;  %v1710_v43 = vmul.f32 %v3101_v27, %v1644_v12 }
 0x239   : > { %v1560_v63 = vadd.f32 %v3096_v49, %v1559_v60  ;;  %v1817_v33 = vrot.slane %v1720_v1, 1  ;;  %v1416_v54 = vsel %vm1407_vm3, %v1402_v17, %v1412_v45  ;;  %v1400_v17 = vadd.f32 %v3135_v57, %v3149_v0  ;;  %v1654_v0 = vpop.f32.mrf.mxu3 }
 0x23a   : > { %v1806_v5 = vmax.f32 %v1778_v42, %v1798_v56  ;;  %v1754_v56 = vrot.slane %v3231_v41, 1  ;;  %v1755_v42 = vrot.slane %v1715_v10, 1 }
 0x23b   : > { %v1571_v4 = vpop.f32.mrf.mxu1  ;;  %v1689_v62 = vmul.f32 %v3101_v27, %v1560_v63  ;;  %vm1661_vm13 = vcmp.ge.f32.partialorder %v1560_v63, 0.0  ;;  %vm1406_vm7 = vcmp.ge.f32.partialorder %v1400_v17, 0.0 }
 0x23c   : > { %v1810_v16 = vmax.f32 %v1806_v5, %v1720_v1  ;;  %v1572_v9 = vadd.f32 %v3096_v49, %v1571_v4 }
 0x23d   : > { %v3228_v35 = vsel %vm1661_vm13, %v1560_v63, %v1689_v62  ;;  %v1737_v63 = vsel %vm1682_vm5, %v1644_v12, %v1710_v43  ;;  %v1395_v43 = vadd.f32 %v3135_v57, %v3125_v32 }
 0x23e   : > { %v1814_v7 = vmax.f32 %v1810_v16, %v1726_v15  ;;  %vm1666_vm12 = vcmp.ge.f32.partialorder %v1572_v9, 0.0  ;;  %v1694_v22 = vmul.f32 %v3101_v27, %v1572_v9  ;;  %v1757_v46 = vrot.slane %v3228_v35, 1 }
 0x23f   : > { %v1741_v60 = vmax.f32 %v3228_v35, %v3210_v50  ;;  %v1756_v16 = vsel %vm1075_vm2, %v1754_v56, %v1755_v42  ;;  %vm1404_vm11 = vcmp.ge.f32.partialorder %v1395_v43, 0.0 }
 0x240   : > { %v1561_v53 = vpop.f32.mrf.mxu0  ;;  %v1721_v28 = vsel %vm1666_vm12, %v1572_v9, %v1694_v22  ;;  %v1795_v9 = vsel %vm1075_vm2, %v1793_v52, %v1794_v44  ;;  %v1411_v22 = vmul.f32 %v3138_v40, %v1400_v17 }
 0x241   : > { %v1562_v31 = vadd.f32 %v3096_v49, %v1561_v53  ;;  %v1818_v34 = vrot.slane %v1721_v28, 1 }
 0x242   : > { %v1415_v24 = vsel %vm1406_vm7, %v1400_v17, %v1411_v22 }
 0x243   : > { %vm1662_vm4 = vcmp.ge.f32.partialorder %v1562_v31, 0.0  ;;  %v1690_v37 = vmul.f32 %v3101_v27, %v1562_v31  ;;  %v1574_v39 = vpop.f32.mrf.mxu1  ;;  %v1819_v47 = vsel %vm1075_vm2, %v1817_v33, %v1818_v34  ;;  %v1636_v33 = vadd.f32 %v3096_v49, %v3104_v11 }
 0x244   : > { %v1824_v51 = vmax.f32 %v1814_v7, %v1819_v47  ;;  %v1655_v39 = vpop.f32.mrf.mxu3 }
 0x245   : > { %v1717_v2 = vsel %vm1662_vm4, %v1562_v31, %v1690_v37  ;;  %v1708_v37 = vmul.f32 %v3101_v27, %v1636_v33  ;;  %vm1680_vm9 = vcmp.ge.f32.partialorder %v1636_v33, 0.0 }
 0x246   : > { %v1758_v55 = vrot.slane %v1717_v2, 1  ;;  %v1828_v18 = vadd.f32 %v1824_v51, %v1416_v54 }
 0x247   : > { %v1735_v8 = vsel %vm1680_vm9, %v1636_v33, %v1708_v37 }
 0x248   : > { %v3243_v5 = vsel %vm1075_vm2, %v1757_v46, %v1758_v55  ;;  %vm1832_vm6 = vcmp.ge.f32.partialorder %v1828_v18, 0.0  ;;  %v1837_v61 = vmul.f32 %v3237_v38, %v1828_v18  ;;  %v1640_v55 = vadd.f32 %v3096_v49, %v3118_v26 }
 0x249   : > { %v1769_v1 = vmax.f32 %v1741_v60, %v3243_v5 }
 0x24a   : > { %v1841_v4 = vsel %vm1832_vm6, %v1828_v18, %v1837_v61  ;;  %v1709_v60 = vmul.f32 %v3101_v27, %v1640_v55  ;;  %vm1681_vm12 = vcmp.ge.f32.partialorder %v1640_v55, 0.0 }
 0x24b   : > { %v1773_v48 = vmax.f32 %v1769_v1, %v1731_v13  ;;  %v1575_v6 = vpop.f32.mrf.mxu1  ;;  %1845 = vst.msk [vmem:[%s3248_s24 + $0x18] sm:$0xff] %vm527_vm0, %v1841_v4 }
 0x24c   : > { %v1736_v44 = vsel %vm1681_vm12, %v1640_v55, %v1709_v60 }
 0x24d   : > { %v1777_v15 = vmax.f32 %v1773_v48, %v1737_v63 }
 0x24f   : > { %v1805_v7 = vmax.f32 %v1777_v15, %v1795_v9 }
 0x251   : > { %v1809_v62 = vmax.f32 %v1805_v7, %v3168_v30 }
 0x253   : > { %v1813_v13 = vmax.f32 %v1809_v62, %v3172_v19  ;;  %v1577_v12 = vpop.f32.mrf.mxu1 }
 0x255   : > { %v1823_v23 = vmax.f32 %v1813_v13, %v3181_v3 }
 0x257   : > { %v1827_v25 = vadd.f32 %v1823_v23, %v1415_v24 }
 0x259   : > { %vm1831_vm2 = vcmp.ge.f32.partialorder %v1827_v25, 0.0  ;;  %v1836_v53 = vmul.f32 %v3237_v38, %v1827_v25 }
 0x25b   : > { %v1840_v28 = vsel %vm1831_vm2, %v1827_v25, %v1836_v53  ;;  %v1578_v31 = vpop.f32.mrf.mxu1 }
 0x25c   : > { %1844 = vst.msk [vmem:[%s3248_s24 + $0x10] sm:$0xff] %vm527_vm0, %v1840_v28 }
 0x263   : > { %v1580_v45 = vpop.f32.mrf.mxu1 }
 0x264   : > { %v1581_v30 = vadd.f32 %v3096_v49, %v1580_v45 }
 0x266   : > { %vm1667_vm8 = vcmp.ge.f32.partialorder %v1581_v30, 0.0  ;;  %v1695_v19 = vmul.f32 %v3101_v27, %v1581_v30 }
 0x268   : > { %v1722_v3 = vsel %vm1667_vm8, %v1581_v30, %v1695_v19 }
 0x269   : > { %v1739_v34 = vmax.f32 %v3183_v58, %v1722_v3 }
 0x26b   : > { %v1767_v10 = vmax.f32 %v1739_v34, %v3203_v21  ;;  %v1582_v46 = vpop.f32.mrf.mxu1 }
 0x26d   : > { %v1771_v47 = vmax.f32 %v1767_v10, %v3108_v59  ;;  %v1409_v59 = vmul.f32 %v3138_v40, %v1395_v43 }
 0x26f   : > { %v1775_v51 = vmax.f32 %v1771_v47, %v1735_v8  ;;  %v1413_v52 = vsel %vm1404_vm11, %v1395_v43, %v1409_v59 }
 0x271   : > { %v1803_v2 = vmax.f32 %v1775_v51, %v3114_v20 }
 0x273   : > { %v1584_v11 = vpop.f32.mrf.mxu1  ;;  %v1807_v54 = vmax.f32 %v1803_v2, %v3231_v41 }
 0x274   : > { %v1585_v58 = vadd.f32 %v3096_v49, %v1584_v11 }
 0x276   : > { %vm1668_vm10 = vcmp.ge.f32.partialorder %v1585_v58, 0.0  ;;  %v1696_v21 = vmul.f32 %v3101_v27, %v1585_v58 }
 0x278   : > { %v1723_v56 = vsel %vm1668_vm10, %v1585_v58, %v1696_v21 }
 0x279   : > { %v1740_v20 = vmax.f32 %v3231_v41, %v1723_v56  ;;  %v1811_v42 = vmax.f32 %v1807_v54, %v1723_v56 }
 0x27b   : > { %v1768_v32 = vmax.f32 %v1740_v20, %v1756_v16  ;;  %v1821_v57 = vmax.f32 %v1811_v42, %v1756_v16  ;;  %v1586_v18 = vpop.f32.mrf.mxu1 }
 0x27d   : > { %v1772_v49 = vmax.f32 %v1768_v32, %v3122_v29  ;;  %v1825_v26 = vadd.f32 %v1821_v57, %v1413_v52 }
 0x27f   : > { %v1776_v61 = vmax.f32 %v1772_v49, %v1736_v44  ;;  %vm1829_vm13 = vcmp.ge.f32.partialorder %v1825_v26, 0.0  ;;  %v1834_v40 = vmul.f32 %v3237_v38, %v1825_v26 }
 0x281   : > { %v1804_v41 = vmax.f32 %v1776_v61, %v3130_v36  ;;  %v1838_v1 = vsel %vm1829_vm13, %v1825_v26, %v1834_v40 }
 0x282   : > { %1842 = vst.msk [vmem:[%s3248_s24] sm:$0xff] %vm527_vm0, %v1838_v1 }
 0x283   : > { %v1808_v27 = vmax.f32 %v1804_v41, %v3228_v35 }
 0x285   : > { %v1812_v63 = vmax.f32 %v1808_v27, %v3210_v50 }
 0x287   : > { %v1822_v4 = vmax.f32 %v1812_v63, %v3243_v5 }
 0x289   : > { %v1826_v29 = vadd.f32 %v1822_v4, %v3141_v14 }
 0x28b   : > { %vm1830_vm14 = vcmp.ge.f32.partialorder %v1826_v29, 0.0  ;;  %v1835_v48 = vmul.f32 %v3237_v38, %v1826_v29 }
 0x28d   : > { %v1839_v6 = vsel %vm1830_vm14, %v1826_v29, %v1835_v48 }
 0x28e   : > { %1843 = vst.msk [vmem:[%s3248_s24 + $0x8] sm:$0xff] %vm527_vm0, %v1839_v6 }
 0x28f PF: > { %s21_s17 = sadd.s32 1, %s2521_s17   ;;  %s3323_s13 = smov %s2513_s15 }
 0x290   : > { %p18_p11 = scmp.ge.s32.totalorder %s21_s17, 6   ;;  %s3324_s14 = smov %s2517_s16 }
 0x291   : > { %s3325_s15 = smov %s3328_s19  ;;  %s3326_s16 = smov %s3332_s20 }
 0x292   :  { %20 = sbr.rel (!%p18_p11) target bundleno = 3 (0x3), region = 95 }
 0x297   :  { %1875 = vsyncpa [#allocation5], 1 }
 0x298   :  { %1877 = vsyncpa [#allocation5 + $0x1], 1 }

</bundles_post_ra>
